<compile_context>
chip_gen: v7x
topology: tpu7x:2x2x1
jax: 0.10.0
libtpu: 0.0.40
codegen_flags: <defaults>
</compile_context>

<pallas_src>
import math

import jax
import jax.numpy as jnp
import numpy as np
from jax import lax
from jax.experimental import pallas as pl
from jax.experimental.pallas import tpu as pltpu

_BN_EPS = 1e-5
_LANE = 128
_SUBLANE = 8
_MAX_BATCH_TILE = 512   # raised from 256 (amortize ~0.35us per-grid-step overhead)


def _round_up(x, m):
    return ((x + m - 1) // m) * m


def _pad2d(a, rows, cols):
    # Zero padding is load-bearing: padded weight/bias lanes must be exactly 0
    # so padded feature lanes stay 0 through the whole network.
    a = jnp.asarray(a, jnp.float32)
    return jnp.pad(a, ((0, rows - a.shape[0]), (0, cols - a.shape[1])))


# ---------------------------------------------------------------------------
# Fused kernel factory.  The block loop unrolls at trace time, so the
# activation `x` lives in vregs/VMEM between blocks.  Two variants: with /
# without embedding outputs.
# ---------------------------------------------------------------------------

def _make_fused_kernel(block_match, mm_dtype, with_embeddings, dot_precision):
    n_blocks = len(block_match)
    n_w = 4 * n_blocks + 2   # per block: (w1[|wa], b1[|ba], w2, b2); final: (wf, bf)

    def kernel(*refs):
        x_ref = refs[0]
        w_refs = refs[1:1 + n_w]
        out_ref = refs[1 + n_w]
        emb_refs = refs[2 + n_w:] if with_embeddings else ()

        # x arrives in mm_dtype (bf16 on the production path -> half the input
        # DMA); carry the activation in f32 for all element-wise math.
        x = x_ref[...].astype(jnp.float32)
        wi = 0
        for bi, match in enumerate(block_match):
            w1, b1, w2, b2 = w_refs[wi:wi + 4]
            wi += 4
            hs = w2.shape[0]                         # padded hidden width
            # linear1 (+ fused dimension_adapter); eval-BN folded into w/b.
            z = jnp.dot(x.astype(mm_dtype), w1[...], precision=dot_precision,
                        preferred_element_type=jnp.float32) + b1[...]
            if match:
                h = jnp.maximum(z[:, :hs], 0.0)      # ReLU
                ident = z[:, hs:]                    # dimension_adapter(identity)
            else:
                h = jnp.maximum(z, 0.0)
                ident = x                            # identity residual
            # dropout == identity (eval mode)
            y = jnp.dot(h.astype(mm_dtype), w2[...], precision=dot_precision,
                        preferred_element_type=jnp.float32) + b2[...]
            x = jnp.maximum(y + ident, 0.0)          # residual add + ReLU (f32)
            if with_embeddings:
                # Exported embeddings may be bf16 (halves writeback bytes).
                emb_refs[bi][...] = x.astype(emb_refs[bi].dtype)
        wf, bf = w_refs[wi], w_refs[wi + 1]
        out_ref[...] = (jnp.dot(x.astype(mm_dtype), wf[...], precision=dot_precision,
                                preferred_element_type=jnp.float32)
                        + bf[...]).astype(out_ref.dtype)

    return kernel


# ---------------------------------------------------------------------------
# Parameter construction (raw, PyTorch-default-style, f32)
# ---------------------------------------------------------------------------

def _init_linear(key, in_f, out_f):
    kw, kb = jax.random.split(key)
    bound = 1.0 / math.sqrt(in_f)
    w = jax.random.uniform(kw, (in_f, out_f), jnp.float32, -bound, bound)  # [in, out]
    b = jax.random.uniform(kb, (out_f,), jnp.float32, -bound, bound)
    return w, b


def _init_bn(key, out_f):
    # Mildly non-trivial running stats so eval-BN folding is actually exercised.
    k1, k2, k3, k4 = jax.random.split(key, 4)
    return dict(gamma=jax.random.uniform(k1, (out_f,), jnp.float32, 0.8, 1.25),
                beta=0.2 * jax.random.normal(k2, (out_f,), jnp.float32),
                mean=0.2 * jax.random.normal(k3, (out_f,), jnp.float32),
                var=jax.random.uniform(k4, (out_f,), jnp.float32, 0.7, 1.4))


def make_params(key, input_size, output_size, hidden_sizes):
    params = {"blocks": [], "input_size": input_size, "output_size": output_size}
    in_f = input_size
    for hs in hidden_sizes:
        key, k1, k2, ka, kb1, kb2 = jax.random.split(key, 6)
        w1, b1 = _init_linear(k1, in_f, hs)
        w2, b2 = _init_linear(k2, hs, hs)
        blk = {"w1": w1, "b1": b1, "w2": w2, "b2": b2,
               "bn1": _init_bn(kb1, hs), "bn2": _init_bn(kb2, hs),
               "match": in_f != hs, "in_f": in_f, "out_f": hs}
        if blk["match"]:
            blk["wa"], blk["ba"] = _init_linear(ka, in_f, hs)
        params["blocks"].append(blk)
        in_f = hs
    key, kf = jax.random.split(key)
    params["wf"], params["bf"] = _init_linear(kf, in_f, output_size)
    return params


# ---------------------------------------------------------------------------
# One-time preparation: fold BN, fuse adapter, pad to 128 lanes, cast weights
# ---------------------------------------------------------------------------

def _fold_bn(w, b, bn):
    scale = bn["gamma"] / jnp.sqrt(bn["var"] + _BN_EPS)
    shift = bn["beta"] - bn["mean"] * scale
    return w * scale[None, :], b * scale + shift


def prepare_kernel_params(params, mm_dtype=jnp.bfloat16):
    # NOTE: eval-BN is folded into the (possibly bf16) matmul weights; with
    # pathological BN stats keep mm_dtype=float32 for numerics debugging.
    flat, block_match = [], []
    for blk in params["blocks"]:
        in_p = _round_up(blk["in_f"], _LANE)
        hs_p = _round_up(blk["out_f"], _LANE)
        w1, b1 = _fold_bn(blk["w1"], blk["b1"], blk["bn1"])
        w2, b2 = _fold_bn(blk["w2"], blk["b2"], blk["bn2"])
        w1p = _pad2d(w1, in_p, hs_p)
        b1p = _pad2d(b1[None, :], 1, hs_p)
        if blk["match"]:
            # Fuse dimension_adapter into linear1 (same LHS): concat along N.
            w1p = jnp.concatenate([w1p, _pad2d(blk["wa"], in_p, hs_p)], axis=1)
            b1p = jnp.concatenate([b1p, _pad2d(blk["ba"][None, :], 1, hs_p)], axis=1)
        flat += [w1p.astype(mm_dtype), b1p,
                 _pad2d(w2, hs_p, hs_p).astype(mm_dtype), _pad2d(b2[None, :], 1, hs_p)]
        block_match.append(bool(blk["match"]))
    last_p = _round_up(params["blocks"][-1]["out_f"], _LANE)
    out_p = _round_up(params["output_size"], _LANE)
    flat += [_pad2d(params["wf"], last_p, out_p).astype(mm_dtype),
             _pad2d(params["bf"][None, :], 1, out_p)]
    meta = {"block_match": tuple(block_match),
            "emb_pads": tuple(_round_up(b["out_f"], _LANE) for b in params["blocks"]),
            "emb_sizes": tuple(b["out_f"] for b in params["blocks"]),
            "in_pad": _round_up(params["input_size"], _LANE),
            "out_size": params["output_size"],
            "out_pad": out_p,
            "mm_dtype": mm_dtype}
    return flat, meta


# ---------------------------------------------------------------------------
# Forward pass: a single pallas_call for the whole network
# ---------------------------------------------------------------------------

def _pick_batch_tile(b_pad):
    # >=2 grid steps whenever possible so dimension_semantics=("parallel",)
    # actually shards the batch across v7x's two TensorCores; cap 512 rows.
    if b_pad <= _SUBLANE:
        return b_pad                       # can't split below one 8-row sublane tile
    if b_pad <= 2 * _MAX_BATCH_TILE:
        return _round_up((b_pad + 1) // 2, _SUBLANE)   # exactly 2 tiles
    return _MAX_BATCH_TILE


def deep_residual_mlp_forward(flat_params, meta, x, *, return_embeddings=True,
                              emb_dtype=jnp.bfloat16, f32_highest_precision=True):
    B = x.shape[0]
    mm_dtype = meta["mm_dtype"]
    b_pad = _round_up(B, _SUBLANE)
    tile_b = _pick_batch_tile(b_pad)
    b_pad = _round_up(b_pad, tile_b)
    # Feed x in mm_dtype (bf16 on the production path) -> half the input DMA.
    x_p = jnp.pad(x.astype(jnp.float32),
                  ((0, b_pad - B), (0, meta["in_pad"] - x.shape[1]))).astype(mm_dtype)

    # f32 operands: request full-fp32 MXU contraction so the f32 path really
    # delivers f32-level accuracy; bf16 operands use the native bf16 MXU path.
    dot_precision = (lax.Precision.HIGHEST
                     if (mm_dtype == jnp.float32 and f32_highest_precision) else None)
    kernel = _make_fused_kernel(meta["block_match"], mm_dtype,
                                return_embeddings, dot_precision)
    grid = (b_pad // tile_b,)

    in_specs = [pl.BlockSpec((tile_b, meta["in_pad"]), lambda i: (i, 0))]
    # Weights/biases: grid-invariant blocks (constant index_map) -> DMA'd once,
    # resident in VMEM across all batch tiles.
    for a in flat_params:
        in_specs.append(pl.BlockSpec(a.shape, lambda i: (0, 0)))

    out_shapes = [jax.ShapeDtypeStruct((b_pad, meta["out_pad"]), jnp.float32)]
    out_specs = [pl.BlockSpec((tile_b, meta["out_pad"]), lambda i: (i, 0))]
    if return_embeddings:
        for hp in meta["emb_pads"]:
            out_shapes.append(jax.ShapeDtypeStruct((b_pad, hp), emb_dtype))
            out_specs.append(pl.BlockSpec((tile_b, hp), lambda i: (i, 0)))

    outs = pl.pallas_call(
        kernel,
        grid=grid,
        in_specs=in_specs,
        out_specs=tuple(out_specs),
        out_shape=tuple(out_shapes),
        compiler_params=pltpu.CompilerParams(
            dimension_semantics=("parallel",)),    # batch tiles -> megacore split
    )(x_p, *flat_params)

    output = outs[0][:B, :meta["out_size"]]
    if not return_embeddings:
        return output
    embeddings = [o[:B, :s] for o, s in zip(outs[1:], meta["emb_sizes"])]
    return (output, *embeddings)


# ---------------------------------------------------------------------------
# Independent float64 NumPy reference (eval-mode PyTorch semantics)
# ---------------------------------------------------------------------------

def _ref_forward_np(params, x):
    def bn(h, p):
        g, b = np.asarray(p["gamma"], np.float64), np.asarray(p["beta"], np.float64)
        m, v = np.asarray(p["mean"], np.float64), np.asarray(p["var"], np.float64)
        return (h - m) / np.sqrt(v + _BN_EPS) * g + b

    x = np.asarray(x, np.float64)
    embs = []
    for blk in params["blocks"]:
        h = bn(x @ np.asarray(blk["w1"], np.float64) + np.asarray(blk["b1"], np.float64),
               blk["bn1"])
        h = np.maximum(h, 0.0)
        y = bn(h @ np.asarray(blk["w2"], np.float64) + np.asarray(blk["b2"], np.float64),
               blk["bn2"])
        if blk["match"]:
            ident = x @ np.asarray(blk["wa"], np.float64) + np.asarray(blk["ba"], np.float64)
        else:
            ident = x
        x = np.maximum(y + ident, 0.0)
        embs.append(x)
    out = x @ np.asarray(params["wf"], np.float64) + np.asarray(params["bf"], np.float64)
    return (out, *embs)


# ---------------------------------------------------------------------------
# Main
# ---------------------------------------------------------------------------

if __name__ == "__main__":
    # Small demo shapes (harness requirement).  Perf note (v6e/v7x): realistic
    # serving should feed >=128-256 rows per tile to approach the MXU roofline.
    batch = 24                        # >8 so the batch splits into 2 grid tiles
    input_size = 32
    output_size = 10
    hidden_sizes = [64, 32, 32, 16]   # block 3 (32 -> 32) exercises the
                                      # identity (no-adapter) residual path

    key = jax.random.PRNGKey(0)
    key, kx, kp = jax.random.split(key, 3)
    x = jax.random.normal(kx, (batch, input_size), jnp.float32)
    params = make_params(kp, input_size, output_size, hidden_sizes)

    refs = _ref_forward_np(params, x)

    # --- Production path: bf16 MXU operands / bf16 x / bf16 embeddings,
    #     f32 accumulate + f32 element-wise math. ---
    flat_bf16, meta_bf16 = prepare_kernel_params(params, mm_dtype=jnp.bfloat16)
    outs_bf16 = jax.block_until_ready(
        deep_residual_mlp_forward(flat_bf16, meta_bf16, x,
                                  return_embeddings=True, emb_dtype=jnp.bfloat16))
    for got, want in zip(outs_bf16, refs):
        np.testing.assert_allclose(np.asarray(got, np.float64), want,
                                   rtol=1e-1, atol=1e-1)

    # --- return_embeddings=False variant: a distinct kernel with a single
    #     lane-dense output stream and no embedding writeback at all. ---
    out_only = jax.block_until_ready(
        deep_residual_mlp_forward(flat_bf16, meta_bf16, x, return_embeddings=False))
    np.testing.assert_allclose(np.asarray(out_only, np.float64), refs[0],
                               rtol=1e-1, atol=1e-1)

    # --- f32 numerics-debug path.  Prefer full-fp32 MXU contraction
    #     (Precision.HIGHEST) with a tight tolerance; if this Pallas/Mosaic
    #     build rejects the precision attribute, fall back to the default
    #     contraction precision with the original looser bound. ---
    flat_f32, meta_f32 = prepare_kernel_params(params, mm_dtype=jnp.float32)
    try:
        outs_f32 = jax.block_until_ready(
            deep_residual_mlp_forward(flat_f32, meta_f32, x, return_embeddings=True,
                                      emb_dtype=jnp.float32,
                                      f32_highest_precision=True))
        f32_tol = 1e-4
    except Exception:
        outs_f32 = jax.block_until_ready(
            deep_residual_mlp_forward(flat_f32, meta_f32, x, return_embeddings=True,
                                      emb_dtype=jnp.float32,
                                      f32_highest_precision=False))
        f32_tol = 5e-2
    for got, want in zip(outs_f32, refs):
        np.testing.assert_allclose(np.asarray(got, np.float64), want,
                                   rtol=f32_tol, atol=f32_tol)

    print("KERNEL_OK")
</pallas_src>

<mosaic_0001>
module attributes {stable_mosaic.version = 11 : i64} {
  func.func @kernel(%arg0: i32, %arg1: memref<16x128xbf16, #tpu.memory_space<vmem>>, %arg2: memref<128x256xbf16, #tpu.memory_space<vmem>>, %arg3: memref<1x256xf32, #tpu.memory_space<vmem>>, %arg4: memref<128x128xbf16, #tpu.memory_space<vmem>>, %arg5: memref<1x128xf32, #tpu.memory_space<vmem>>, %arg6: memref<128x256xbf16, #tpu.memory_space<vmem>>, %arg7: memref<1x256xf32, #tpu.memory_space<vmem>>, %arg8: memref<128x128xbf16, #tpu.memory_space<vmem>>, %arg9: memref<1x128xf32, #tpu.memory_space<vmem>>, %arg10: memref<128x128xbf16, #tpu.memory_space<vmem>>, %arg11: memref<1x128xf32, #tpu.memory_space<vmem>>, %arg12: memref<128x128xbf16, #tpu.memory_space<vmem>>, %arg13: memref<1x128xf32, #tpu.memory_space<vmem>>, %arg14: memref<128x256xbf16, #tpu.memory_space<vmem>>, %arg15: memref<1x256xf32, #tpu.memory_space<vmem>>, %arg16: memref<128x128xbf16, #tpu.memory_space<vmem>>, %arg17: memref<1x128xf32, #tpu.memory_space<vmem>>, %arg18: memref<128x128xbf16, #tpu.memory_space<vmem>>, %arg19: memref<1x128xf32, #tpu.memory_space<vmem>>, %arg20: memref<16x128xf32, #tpu.memory_space<vmem>>, %arg21: memref<16x128xbf16, #tpu.memory_space<vmem>>, %arg22: memref<16x128xbf16, #tpu.memory_space<vmem>>, %arg23: memref<16x128xbf16, #tpu.memory_space<vmem>>, %arg24: memref<16x128xbf16, #tpu.memory_space<vmem>>) attributes {dimension_semantics = [#tpu.dimension_semantics<parallel>], iteration_bounds = array<i64: 2>, scalar_prefetch = 0 : i64, scratch_operands = 0 : i64, tpu.core_type = #tpu.core_type<tc>, window_params = [{transform_indices = @transform_0, window_bounds = array<i64: 16, 128>}, {pipeline_mode = #tpu.pipeline_mode<synchronous>, transform_indices = @transform_1, window_bounds = array<i64: 128, 256>}, {pipeline_mode = #tpu.pipeline_mode<synchronous>, transform_indices = @transform_2, window_bounds = array<i64: 1, 256>}, {pipeline_mode = #tpu.pipeline_mode<synchronous>, transform_indices = @transform_3, window_bounds = array<i64: 128, 128>}, {pipeline_mode = #tpu.pipeline_mode<synchronous>, transform_indices = @transform_4, window_bounds = array<i64: 1, 128>}, {pipeline_mode = #tpu.pipeline_mode<synchronous>, transform_indices = @transform_5, window_bounds = array<i64: 128, 256>}, {pipeline_mode = #tpu.pipeline_mode<synchronous>, transform_indices = @transform_6, window_bounds = array<i64: 1, 256>}, {pipeline_mode = #tpu.pipeline_mode<synchronous>, transform_indices = @transform_7, window_bounds = array<i64: 128, 128>}, {pipeline_mode = #tpu.pipeline_mode<synchronous>, transform_indices = @transform_8, window_bounds = array<i64: 1, 128>}, {pipeline_mode = #tpu.pipeline_mode<synchronous>, transform_indices = @transform_9, window_bounds = array<i64: 128, 128>}, {pipeline_mode = #tpu.pipeline_mode<synchronous>, transform_indices = @transform_10, window_bounds = array<i64: 1, 128>}, {pipeline_mode = #tpu.pipeline_mode<synchronous>, transform_indices = @transform_11, window_bounds = array<i64: 128, 128>}, {pipeline_mode = #tpu.pipeline_mode<synchronous>, transform_indices = @transform_12, window_bounds = array<i64: 1, 128>}, {pipeline_mode = #tpu.pipeline_mode<synchronous>, transform_indices = @transform_13, window_bounds = array<i64: 128, 256>}, {pipeline_mode = #tpu.pipeline_mode<synchronous>, transform_indices = @transform_14, window_bounds = array<i64: 1, 256>}, {pipeline_mode = #tpu.pipeline_mode<synchronous>, transform_indices = @transform_15, window_bounds = array<i64: 128, 128>}, {pipeline_mode = #tpu.pipeline_mode<synchronous>, transform_indices = @transform_16, window_bounds = array<i64: 1, 128>}, {pipeline_mode = #tpu.pipeline_mode<synchronous>, transform_indices = @transform_17, window_bounds = array<i64: 128, 128>}, {pipeline_mode = #tpu.pipeline_mode<synchronous>, transform_indices = @transform_18, window_bounds = array<i64: 1, 128>}, {transform_indices = @transform_19, window_bounds = array<i64: 16, 128>}, {transform_indices = @transform_20, window_bounds = array<i64: 16, 128>}, {transform_indices = @transform_21, window_bounds = array<i64: 16, 128>}, {transform_indices = @transform_22, window_bounds = array<i64: 16, 128>}, {transform_indices = @transform_23, window_bounds = array<i64: 16, 128>}]} {
    %c0 = arith.constant 0 : index
    %c0_0 = arith.constant 0 : index
    %0 = vector.load %arg1[%c0, %c0_0] : memref<16x128xbf16, #tpu.memory_space<vmem>>, vector<16x128xbf16>
    %1 = arith.extf %0 : vector<16x128xbf16> to vector<16x128xf32>
    %2 = arith.truncf %1 : vector<16x128xf32> to vector<16x128xbf16>
    %c0_1 = arith.constant 0 : index
    %c0_2 = arith.constant 0 : index
    %3 = vector.load %arg2[%c0_1, %c0_2] : memref<128x256xbf16, #tpu.memory_space<vmem>>, vector<128x256xbf16>
    %cst = arith.constant dense<0.000000e+00> : vector<16x256xf32>
    %4 = tpu.matmul %2, %3, %cst {dimension_numbers = #tpu.dot_dimension_numbers<[1], [0], [0], [1], [0, 0, 1, 1], [], []>} : vector<16x128xbf16>, vector<128x256xbf16>, vector<16x256xf32> -> vector<16x256xf32>
    %c0_3 = arith.constant 0 : index
    %c0_4 = arith.constant 0 : index
    %5 = vector.load %arg3[%c0_3, %c0_4] : memref<1x256xf32, #tpu.memory_space<vmem>>, vector<1x256xf32>
    %6 = vector.broadcast %5 : vector<1x256xf32> to vector<16x256xf32>
    %7 = arith.addf %4, %6 : vector<16x256xf32>
    %8 = vector.extract_strided_slice %7 {offsets = [0, 0], sizes = [16, 128], strides = [1, 1]} : vector<16x256xf32> to vector<16x128xf32>
    %cst_5 = arith.constant 0.000000e+00 : f32
    %9 = vector.broadcast %cst_5 : f32 to vector<16x128xf32>
    %10 = arith.maximumf %8, %9 : vector<16x128xf32>
    %11 = vector.extract_strided_slice %7 {offsets = [0, 128], sizes = [16, 128], strides = [1, 1]} : vector<16x256xf32> to vector<16x128xf32>
    %12 = arith.truncf %10 : vector<16x128xf32> to vector<16x128xbf16>
    %c0_6 = arith.constant 0 : index
    %c0_7 = arith.constant 0 : index
    %13 = vector.load %arg4[%c0_6, %c0_7] : memref<128x128xbf16, #tpu.memory_space<vmem>>, vector<128x128xbf16>
    %cst_8 = arith.constant dense<0.000000e+00> : vector<16x128xf32>
    %14 = tpu.matmul %12, %13, %cst_8 {dimension_numbers = #tpu.dot_dimension_numbers<[1], [0], [0], [1], [0, 0, 1, 1], [], []>} : vector<16x128xbf16>, vector<128x128xbf16>, vector<16x128xf32> -> vector<16x128xf32>
    %c0_9 = arith.constant 0 : index
    %c0_10 = arith.constant 0 : index
    %15 = vector.load %arg5[%c0_9, %c0_10] : memref<1x128xf32, #tpu.memory_space<vmem>>, vector<1x128xf32>
    %16 = vector.broadcast %15 : vector<1x128xf32> to vector<16x128xf32>
    %17 = arith.addf %14, %16 : vector<16x128xf32>
    %18 = arith.addf %17, %11 : vector<16x128xf32>
    %cst_11 = arith.constant 0.000000e+00 : f32
    %19 = vector.broadcast %cst_11 : f32 to vector<16x128xf32>
    %20 = arith.maximumf %18, %19 : vector<16x128xf32>
    %21 = arith.truncf %20 : vector<16x128xf32> to vector<16x128xbf16>
    %c0_12 = arith.constant 0 : index
    %c0_13 = arith.constant 0 : index
    %22 = vector.load %arg21[%c0_12, %c0_13] : memref<16x128xbf16, #tpu.memory_space<vmem>>, vector<16x128xbf16>
    tpu.vector_store %arg21[%c0_12, %c0_13], %21 {strides = array<i32>} : memref<16x128xbf16, #tpu.memory_space<vmem>>, vector<16x128xbf16>,
    %23 = arith.truncf %20 : vector<16x128xf32> to vector<16x128xbf16>
    %c0_14 = arith.constant 0 : index
    %c0_15 = arith.constant 0 : index
    %24 = vector.load %arg6[%c0_14, %c0_15] : memref<128x256xbf16, #tpu.memory_space<vmem>>, vector<128x256xbf16>
    %cst_16 = arith.constant dense<0.000000e+00> : vector<16x256xf32>
    %25 = tpu.matmul %23, %24, %cst_16 {dimension_numbers = #tpu.dot_dimension_numbers<[1], [0], [0], [1], [0, 0, 1, 1], [], []>} : vector<16x128xbf16>, vector<128x256xbf16>, vector<16x256xf32> -> vector<16x256xf32>
    %c0_17 = arith.constant 0 : index
    %c0_18 = arith.constant 0 : index
    %26 = vector.load %arg7[%c0_17, %c0_18] : memref<1x256xf32, #tpu.memory_space<vmem>>, vector<1x256xf32>
    %27 = vector.broadcast %26 : vector<1x256xf32> to vector<16x256xf32>
    %28 = arith.addf %25, %27 : vector<16x256xf32>
    %29 = vector.extract_strided_slice %28 {offsets = [0, 0], sizes = [16, 128], strides = [1, 1]} : vector<16x256xf32> to vector<16x128xf32>
    %cst_19 = arith.constant 0.000000e+00 : f32
    %30 = vector.broadcast %cst_19 : f32 to vector<16x128xf32>
    %31 = arith.maximumf %29, %30 : vector<16x128xf32>
    %32 = vector.extract_strided_slice %28 {offsets = [0, 128], sizes = [16, 128], strides = [1, 1]} : vector<16x256xf32> to vector<16x128xf32>
    %33 = arith.truncf %31 : vector<16x128xf32> to vector<16x128xbf16>
    %c0_20 = arith.constant 0 : index
    %c0_21 = arith.constant 0 : index
    %34 = vector.load %arg8[%c0_20, %c0_21] : memref<128x128xbf16, #tpu.memory_space<vmem>>, vector<128x128xbf16>
    %cst_22 = arith.constant dense<0.000000e+00> : vector<16x128xf32>
    %35 = tpu.matmul %33, %34, %cst_22 {dimension_numbers = #tpu.dot_dimension_numbers<[1], [0], [0], [1], [0, 0, 1, 1], [], []>} : vector<16x128xbf16>, vector<128x128xbf16>, vector<16x128xf32> -> vector<16x128xf32>
    %c0_23 = arith.constant 0 : index
    %c0_24 = arith.constant 0 : index
    %36 = vector.load %arg9[%c0_23, %c0_24] : memref<1x128xf32, #tpu.memory_space<vmem>>, vector<1x128xf32>
    %37 = vector.broadcast %36 : vector<1x128xf32> to vector<16x128xf32>
    %38 = arith.addf %35, %37 : vector<16x128xf32>
    %39 = arith.addf %38, %32 : vector<16x128xf32>
    %cst_25 = arith.constant 0.000000e+00 : f32
    %40 = vector.broadcast %cst_25 : f32 to vector<16x128xf32>
    %41 = arith.maximumf %39, %40 : vector<16x128xf32>
    %42 = arith.truncf %41 : vector<16x128xf32> to vector<16x128xbf16>
    %c0_26 = arith.constant 0 : index
    %c0_27 = arith.constant 0 : index
    %43 = vector.load %arg22[%c0_26, %c0_27] : memref<16x128xbf16, #tpu.memory_space<vmem>>, vector<16x128xbf16>
    tpu.vector_store %arg22[%c0_26, %c0_27], %42 {strides = array<i32>} : memref<16x128xbf16, #tpu.memory_space<vmem>>, vector<16x128xbf16>,
    %44 = arith.truncf %41 : vector<16x128xf32> to vector<16x128xbf16>
    %c0_28 = arith.constant 0 : index
    %c0_29 = arith.constant 0 : index
    %45 = vector.load %arg10[%c0_28, %c0_29] : memref<128x128xbf16, #tpu.memory_space<vmem>>, vector<128x128xbf16>
    %cst_30 = arith.constant dense<0.000000e+00> : vector<16x128xf32>
    %46 = tpu.matmul %44, %45, %cst_30 {dimension_numbers = #tpu.dot_dimension_numbers<[1], [0], [0], [1], [0, 0, 1, 1], [], []>} : vector<16x128xbf16>, vector<128x128xbf16>, vector<16x128xf32> -> vector<16x128xf32>
    %c0_31 = arith.constant 0 : index
    %c0_32 = arith.constant 0 : index
    %47 = vector.load %arg11[%c0_31, %c0_32] : memref<1x128xf32, #tpu.memory_space<vmem>>, vector<1x128xf32>
    %48 = vector.broadcast %47 : vector<1x128xf32> to vector<16x128xf32>
    %49 = arith.addf %46, %48 : vector<16x128xf32>
    %cst_33 = arith.constant 0.000000e+00 : f32
    %50 = vector.broadcast %cst_33 : f32 to vector<16x128xf32>
    %51 = arith.maximumf %49, %50 : vector<16x128xf32>
    %52 = arith.truncf %51 : vector<16x128xf32> to vector<16x128xbf16>
    %c0_34 = arith.constant 0 : index
    %c0_35 = arith.constant 0 : index
    %53 = vector.load %arg12[%c0_34, %c0_35] : memref<128x128xbf16, #tpu.memory_space<vmem>>, vector<128x128xbf16>
    %cst_36 = arith.constant dense<0.000000e+00> : vector<16x128xf32>
    %54 = tpu.matmul %52, %53, %cst_36 {dimension_numbers = #tpu.dot_dimension_numbers<[1], [0], [0], [1], [0, 0, 1, 1], [], []>} : vector<16x128xbf16>, vector<128x128xbf16>, vector<16x128xf32> -> vector<16x128xf32>
    %c0_37 = arith.constant 0 : index
    %c0_38 = arith.constant 0 : index
    %55 = vector.load %arg13[%c0_37, %c0_38] : memref<1x128xf32, #tpu.memory_space<vmem>>, vector<1x128xf32>
    %56 = vector.broadcast %55 : vector<1x128xf32> to vector<16x128xf32>
    %57 = arith.addf %54, %56 : vector<16x128xf32>
    %58 = arith.addf %57, %41 : vector<16x128xf32>
    %cst_39 = arith.constant 0.000000e+00 : f32
    %59 = vector.broadcast %cst_39 : f32 to vector<16x128xf32>
    %60 = arith.maximumf %58, %59 : vector<16x128xf32>
    %61 = arith.truncf %60 : vector<16x128xf32> to vector<16x128xbf16>
    %c0_40 = arith.constant 0 : index
    %c0_41 = arith.constant 0 : index
    %62 = vector.load %arg23[%c0_40, %c0_41] : memref<16x128xbf16, #tpu.memory_space<vmem>>, vector<16x128xbf16>
    tpu.vector_store %arg23[%c0_40, %c0_41], %61 {strides = array<i32>} : memref<16x128xbf16, #tpu.memory_space<vmem>>, vector<16x128xbf16>,
    %63 = arith.truncf %60 : vector<16x128xf32> to vector<16x128xbf16>
    %c0_42 = arith.constant 0 : index
    %c0_43 = arith.constant 0 : index
    %64 = vector.load %arg14[%c0_42, %c0_43] : memref<128x256xbf16, #tpu.memory_space<vmem>>, vector<128x256xbf16>
    %cst_44 = arith.constant dense<0.000000e+00> : vector<16x256xf32>
    %65 = tpu.matmul %63, %64, %cst_44 {dimension_numbers = #tpu.dot_dimension_numbers<[1], [0], [0], [1], [0, 0, 1, 1], [], []>} : vector<16x128xbf16>, vector<128x256xbf16>, vector<16x256xf32> -> vector<16x256xf32>
    %c0_45 = arith.constant 0 : index
    %c0_46 = arith.constant 0 : index
    %66 = vector.load %arg15[%c0_45, %c0_46] : memref<1x256xf32, #tpu.memory_space<vmem>>, vector<1x256xf32>
    %67 = vector.broadcast %66 : vector<1x256xf32> to vector<16x256xf32>
    %68 = arith.addf %65, %67 : vector<16x256xf32>
    %69 = vector.extract_strided_slice %68 {offsets = [0, 0], sizes = [16, 128], strides = [1, 1]} : vector<16x256xf32> to vector<16x128xf32>
    %cst_47 = arith.constant 0.000000e+00 : f32
    %70 = vector.broadcast %cst_47 : f32 to vector<16x128xf32>
    %71 = arith.maximumf %69, %70 : vector<16x128xf32>
    %72 = vector.extract_strided_slice %68 {offsets = [0, 128], sizes = [16, 128], strides = [1, 1]} : vector<16x256xf32> to vector<16x128xf32>
    %73 = arith.truncf %71 : vector<16x128xf32> to vector<16x128xbf16>
    %c0_48 = arith.constant 0 : index
    %c0_49 = arith.constant 0 : index
    %74 = vector.load %arg16[%c0_48, %c0_49] : memref<128x128xbf16, #tpu.memory_space<vmem>>, vector<128x128xbf16>
    %cst_50 = arith.constant dense<0.000000e+00> : vector<16x128xf32>
    %75 = tpu.matmul %73, %74, %cst_50 {dimension_numbers = #tpu.dot_dimension_numbers<[1], [0], [0], [1], [0, 0, 1, 1], [], []>} : vector<16x128xbf16>, vector<128x128xbf16>, vector<16x128xf32> -> vector<16x128xf32>
    %c0_51 = arith.constant 0 : index
    %c0_52 = arith.constant 0 : index
    %76 = vector.load %arg17[%c0_51, %c0_52] : memref<1x128xf32, #tpu.memory_space<vmem>>, vector<1x128xf32>
    %77 = vector.broadcast %76 : vector<1x128xf32> to vector<16x128xf32>
    %78 = arith.addf %75, %77 : vector<16x128xf32>
    %79 = arith.addf %78, %72 : vector<16x128xf32>
    %cst_53 = arith.constant 0.000000e+00 : f32
    %80 = vector.broadcast %cst_53 : f32 to vector<16x128xf32>
    %81 = arith.maximumf %79, %80 : vector<16x128xf32>
    %82 = arith.truncf %81 : vector<16x128xf32> to vector<16x128xbf16>
    %c0_54 = arith.constant 0 : index
    %c0_55 = arith.constant 0 : index
    %83 = vector.load %arg24[%c0_54, %c0_55] : memref<16x128xbf16, #tpu.memory_space<vmem>>, vector<16x128xbf16>
    tpu.vector_store %arg24[%c0_54, %c0_55], %82 {strides = array<i32>} : memref<16x128xbf16, #tpu.memory_space<vmem>>, vector<16x128xbf16>,
    %84 = arith.truncf %81 : vector<16x128xf32> to vector<16x128xbf16>
    %c0_56 = arith.constant 0 : index
    %c0_57 = arith.constant 0 : index
    %85 = vector.load %arg18[%c0_56, %c0_57] : memref<128x128xbf16, #tpu.memory_space<vmem>>, vector<128x128xbf16>
    %cst_58 = arith.constant dense<0.000000e+00> : vector<16x128xf32>
    %86 = tpu.matmul %84, %85, %cst_58 {dimension_numbers = #tpu.dot_dimension_numbers<[1], [0], [0], [1], [0, 0, 1, 1], [], []>} : vector<16x128xbf16>, vector<128x128xbf16>, vector<16x128xf32> -> vector<16x128xf32>
    %c0_59 = arith.constant 0 : index
    %c0_60 = arith.constant 0 : index
    %87 = vector.load %arg19[%c0_59, %c0_60] : memref<1x128xf32, #tpu.memory_space<vmem>>, vector<1x128xf32>
    %88 = vector.broadcast %87 : vector<1x128xf32> to vector<16x128xf32>
    %89 = arith.addf %86, %88 : vector<16x128xf32>
    %c0_61 = arith.constant 0 : index
    %c0_62 = arith.constant 0 : index
    %90 = vector.load %arg20[%c0_61, %c0_62] : memref<16x128xf32, #tpu.memory_space<vmem>>, vector<16x128xf32>
    tpu.vector_store %arg20[%c0_61, %c0_62], %89 {strides = array<i32>} : memref<16x128xf32, #tpu.memory_space<vmem>>, vector<16x128xf32>,
    return
  }
  func.func @transform_0(%arg0: i32) -> (i32, i32) {
    %c0_i32 = arith.constant 0 : i32
    %c0_i32_0 = arith.constant 0 : i32
    return %arg0, %c0_i32 : i32, i32
  }
  func.func @transform_1(%arg0: i32) -> (i32, i32) {
    %c0_i32 = arith.constant 0 : i32
    %c0_i32_0 = arith.constant 0 : i32
    %c0_i32_1 = arith.constant 0 : i32
    return %c0_i32, %c0_i32_0 : i32, i32
  }
  func.func @transform_2(%arg0: i32) -> (i32, i32) {
    %c0_i32 = arith.constant 0 : i32
    %c0_i32_0 = arith.constant 0 : i32
    %c0_i32_1 = arith.constant 0 : i32
    return %c0_i32, %c0_i32_0 : i32, i32
  }
  func.func @transform_3(%arg0: i32) -> (i32, i32) {
    %c0_i32 = arith.constant 0 : i32
    %c0_i32_0 = arith.constant 0 : i32
    %c0_i32_1 = arith.constant 0 : i32
    return %c0_i32, %c0_i32_0 : i32, i32
  }
  func.func @transform_4(%arg0: i32) -> (i32, i32) {
    %c0_i32 = arith.constant 0 : i32
    %c0_i32_0 = arith.constant 0 : i32
    %c0_i32_1 = arith.constant 0 : i32
    return %c0_i32, %c0_i32_0 : i32, i32
  }
  func.func @transform_5(%arg0: i32) -> (i32, i32) {
    %c0_i32 = arith.constant 0 : i32
    %c0_i32_0 = arith.constant 0 : i32
    %c0_i32_1 = arith.constant 0 : i32
    return %c0_i32, %c0_i32_0 : i32, i32
  }
  func.func @transform_6(%arg0: i32) -> (i32, i32) {
    %c0_i32 = arith.constant 0 : i32
    %c0_i32_0 = arith.constant 0 : i32
    %c0_i32_1 = arith.constant 0 : i32
    return %c0_i32, %c0_i32_0 : i32, i32
  }
  func.func @transform_7(%arg0: i32) -> (i32, i32) {
    %c0_i32 = arith.constant 0 : i32
    %c0_i32_0 = arith.constant 0 : i32
    %c0_i32_1 = arith.constant 0 : i32
    return %c0_i32, %c0_i32_0 : i32, i32
  }
  func.func @transform_8(%arg0: i32) -> (i32, i32) {
    %c0_i32 = arith.constant 0 : i32
    %c0_i32_0 = arith.constant 0 : i32
    %c0_i32_1 = arith.constant 0 : i32
    return %c0_i32, %c0_i32_0 : i32, i32
  }
  func.func @transform_9(%arg0: i32) -> (i32, i32) {
    %c0_i32 = arith.constant 0 : i32
    %c0_i32_0 = arith.constant 0 : i32
    %c0_i32_1 = arith.constant 0 : i32
    return %c0_i32, %c0_i32_0 : i32, i32
  }
  func.func @transform_10(%arg0: i32) -> (i32, i32) {
    %c0_i32 = arith.constant 0 : i32
    %c0_i32_0 = arith.constant 0 : i32
    %c0_i32_1 = arith.constant 0 : i32
    return %c0_i32, %c0_i32_0 : i32, i32
  }
  func.func @transform_11(%arg0: i32) -> (i32, i32) {
    %c0_i32 = arith.constant 0 : i32
    %c0_i32_0 = arith.constant 0 : i32
    %c0_i32_1 = arith.constant 0 : i32
    return %c0_i32, %c0_i32_0 : i32, i32
  }
  func.func @transform_12(%arg0: i32) -> (i32, i32) {
    %c0_i32 = arith.constant 0 : i32
    %c0_i32_0 = arith.constant 0 : i32
    %c0_i32_1 = arith.constant 0 : i32
    return %c0_i32, %c0_i32_0 : i32, i32
  }
  func.func @transform_13(%arg0: i32) -> (i32, i32) {
    %c0_i32 = arith.constant 0 : i32
    %c0_i32_0 = arith.constant 0 : i32
    %c0_i32_1 = arith.constant 0 : i32
    return %c0_i32, %c0_i32_0 : i32, i32
  }
  func.func @transform_14(%arg0: i32) -> (i32, i32) {
    %c0_i32 = arith.constant 0 : i32
    %c0_i32_0 = arith.constant 0 : i32
    %c0_i32_1 = arith.constant 0 : i32
    return %c0_i32, %c0_i32_0 : i32, i32
  }
  func.func @transform_15(%arg0: i32) -> (i32, i32) {
    %c0_i32 = arith.constant 0 : i32
    %c0_i32_0 = arith.constant 0 : i32
    %c0_i32_1 = arith.constant 0 : i32
    return %c0_i32, %c0_i32_0 : i32, i32
  }
  func.func @transform_16(%arg0: i32) -> (i32, i32) {
    %c0_i32 = arith.constant 0 : i32
    %c0_i32_0 = arith.constant 0 : i32
    %c0_i32_1 = arith.constant 0 : i32
    return %c0_i32, %c0_i32_0 : i32, i32
  }
  func.func @transform_17(%arg0: i32) -> (i32, i32) {
    %c0_i32 = arith.constant 0 : i32
    %c0_i32_0 = arith.constant 0 : i32
    %c0_i32_1 = arith.constant 0 : i32
    return %c0_i32, %c0_i32_0 : i32, i32
  }
  func.func @transform_18(%arg0: i32) -> (i32, i32) {
    %c0_i32 = arith.constant 0 : i32
    %c0_i32_0 = arith.constant 0 : i32
    %c0_i32_1 = arith.constant 0 : i32
    return %c0_i32, %c0_i32_0 : i32, i32
  }
  func.func @transform_19(%arg0: i32) -> (i32, i32) {
    %c0_i32 = arith.constant 0 : i32
    %c0_i32_0 = arith.constant 0 : i32
    return %arg0, %c0_i32 : i32, i32
  }
  func.func @transform_20(%arg0: i32) -> (i32, i32) {
    %c0_i32 = arith.constant 0 : i32
    %c0_i32_0 = arith.constant 0 : i32
    return %arg0, %c0_i32 : i32, i32
  }
  func.func @transform_21(%arg0: i32) -> (i32, i32) {
    %c0_i32 = arith.constant 0 : i32
    %c0_i32_0 = arith.constant 0 : i32
    return %arg0, %c0_i32 : i32, i32
  }
  func.func @transform_22(%arg0: i32) -> (i32, i32) {
    %c0_i32 = arith.constant 0 : i32
    %c0_i32_0 = arith.constant 0 : i32
    return %arg0, %c0_i32 : i32, i32
  }
  func.func @transform_23(%arg0: i32) -> (i32, i32) {
    %c0_i32 = arith.constant 0 : i32
    %c0_i32_0 = arith.constant 0 : i32
    return %arg0, %c0_i32 : i32, i32
  }
}

</mosaic_0001>

<bundles_post_ra>
// kernel: tpu_custom_call.1
= control target key start
LH: loop header
LB: loop body
LE: loop exit
PB: predicated region body
PF: predicated region fallthrough
CT: control target
= control target key end

     0   :  { %s5068_s0 = inlined_call_operand.hbm [shape: bf16[32,128], index: 0, kind: input, shape index: {}]   ;;  %s5069_s1 = inlined_call_operand.hbm [shape: bf16[128,256], index: 1, kind: input, shape index: {}]   ;;  %s5070_s2 = inlined_call_operand.hbm [shape: f32[1,256], index: 2, kind: input, shape index: {}]   ;;  %s5071_s3 = inlined_call_operand.hbm [shape: bf16[128,128], index: 3, kind: input, shape index: {}]   ;;  %s5072_s4 = inlined_call_operand.hbm [shape: f32[1,128], index: 4, kind: input, shape index: {}]   ;;  %s5073_s5 = inlined_call_operand.hbm [shape: bf16[128,256], index: 5, kind: input, shape index: {}]   ;;  %s5074_s6 = inlined_call_operand.hbm [shape: f32[1,256], index: 6, kind: input, shape index: {}]   ;;  %s5075_s7 = inlined_call_operand.hbm [shape: bf16[128,128], index: 7, kind: input, shape index: {}]   ;;  %s5076_s8 = inlined_call_operand.hbm [shape: f32[1,128], index: 8, kind: input, shape index: {}]   ;;  %s5077_s9 = inlined_call_operand.hbm [shape: bf16[128,128], index: 9, kind: input, shape index: {}]   ;;  %s5078_s10 = inlined_call_operand.hbm [shape: f32[1,128], index: 10, kind: input, shape index: {}]   ;;  %s5079_s11 = inlined_call_operand.hbm [shape: bf16[128,128], index: 11, kind: input, shape index: {}]   ;;  %s5080_s12 = inlined_call_operand.hbm [shape: f32[1,128], index: 12, kind: input, shape index: {}]   ;;  %s5081_s13 = inlined_call_operand.hbm [shape: bf16[128,256], index: 13, kind: input, shape index: {}]   ;;  %s5082_s14 = inlined_call_operand.hbm [shape: f32[1,256], index: 14, kind: input, shape index: {}]   ;;  %s5083_s15 = inlined_call_operand.hbm [shape: bf16[128,128], index: 15, kind: input, shape index: {}]   ;;  %s5084_s16 = inlined_call_operand.hbm [shape: f32[1,128], index: 16, kind: input, shape index: {}]   ;;  %s5085_s17 = inlined_call_operand.vmem [shape: bf16[128,128], index: 17, kind: input, shape index: {}]   ;;  %s5086_s18 = inlined_call_operand.vmem [shape: f32[1,128], index: 18, kind: input, shape index: {}]   ;;  %s5087_s19 = inlined_call_operand.hbm [shape: f32[32,128], index: 19, kind: output, shape index: {0}]   ;;  %s5088_s20 = inlined_call_operand.hbm [shape: bf16[32,128], index: 20, kind: output, shape index: {1}]   ;;  %s5089_s21 = inlined_call_operand.hbm [shape: bf16[32,128], index: 21, kind: output, shape index: {2}]   ;;  %s5090_s22 = inlined_call_operand.hbm [shape: bf16[32,128], index: 22, kind: output, shape index: {3}]   ;;  %s5091_s23 = inlined_call_operand.hbm [shape: bf16[32,128], index: 23, kind: output, shape index: {4}]  }
   0x1   :  { %5131 = sst [smem:[#allocation51_spill]] %s5068_s0 }
   0x2   :  { %5132 = sst [smem:[#allocation52_spill]] %s5069_s1 }
   0x3   :  { %5133 = sst [smem:[#allocation53_spill]] %s5070_s2 }
   0x4   :  { %5134 = sst [smem:[#allocation54_spill]] %s5071_s3 }
   0x5   :  { %5135 = sst [smem:[#allocation55_spill]] %s5072_s4 }
   0x6   :  { %5136 = sst [smem:[#allocation56_spill]] %s5073_s5 }
   0x7   :  { %5137 = sst [smem:[#allocation57_spill]] %s5074_s6 }
   0x8   :  { %5138 = sst [smem:[#allocation58_spill]] %s5075_s7 }
   0x9   :  { %5139 = sst [smem:[#allocation59_spill]] %s5076_s8 }
   0xa   :  { %5140 = sst [smem:[#allocation60_spill]] %s5077_s9 }
   0xb   :  { %5141 = sst [smem:[#allocation61_spill]] %s5078_s10 }
   0xc   :  { %5142 = sst [smem:[#allocation62_spill]] %s5079_s11 }
   0xd   :  { %5143 = sst [smem:[#allocation63_spill]] %s5080_s12 }
   0xe   :  { %5144 = sst [smem:[#allocation64_spill]] %s5081_s13 }
   0xf   :  { %5145 = sst [smem:[#allocation65_spill]] %s5082_s14 }
  0x10   :  { %5146 = sst [smem:[#allocation66_spill]] %s5083_s15 }
  0x11   :  { %5147 = sst [smem:[#allocation67_spill]] %s5084_s16 }
  0x12   :  { %5148 = sst [smem:[#allocation68_spill]] %s5085_s17 }
  0x13   :  { %5149 = sst [smem:[#allocation69_spill]] %s5086_s18 }
  0x14   :  { %5150 = sst [smem:[#allocation70_spill]] %s5087_s19 }
  0x15   :  { %5151 = sst [smem:[#allocation71_spill]] %s5088_s20 }
  0x16   :  { %5152 = sst [smem:[#allocation72_spill]] %s5089_s21 }
  0x17   :  { %5153 = sst [smem:[#allocation73_spill]] %s5090_s22 }
  0x18   :  { %5154 = sst [smem:[#allocation74_spill]] %s5091_s23 }
  0x19   :  { %29 = vsyncpa [#allocation3], 0 }
  0x1a   :  { %31 = vsyncpa [#allocation3 + $0x1], 0 }
  0x1b   :  { %32 = vsyncpa [#allocation6], 0 }
  0x1c   :  { %33 = vsyncpa [#allocation9], 0 }
  0x1d   :  { %34 = vsyncpa [#allocation12], 0 }
  0x1e   :  { %35 = vsyncpa [#allocation15], 0 }
  0x1f   :  { %36 = vsyncpa [#allocation18], 0 }
  0x20   :  { %37 = vsyncpa [#allocation21], 0 }
  0x21   :  { %38 = vsyncpa [#allocation24], 0 }
  0x22   :  { %39 = vsyncpa [#allocation27], 0 }
  0x23   :  { %40 = vsyncpa [#allocation4], 0 }
  0x24   :  { %42 = vsyncpa [#allocation4 + $0x1], 0 }
  0x25   :  { %43 = vsyncpa [#allocation31], 0 }
  0x26   :  { %45 = vsyncpa [#allocation31 + $0x1], 0 }
  0x27   :  { %46 = vsyncpa [#allocation34], 0 }
  0x28   :  { %48 = vsyncpa [#allocation34 + $0x1], 0  ;;  %s4226_s4 = smov 0   ;;  %s4228_s30 = smov 0  }
  0x29   :  { %s4230_s24 = smov 0   ;;  %s4232_s25 = smov 0  }
  0x2a LB: > { %5155 = sst [smem:[#allocation48_spill]] %s4059_s4  ;;  %s4073_s5 = smov [#allocation5]   ;;  %s4071_s25 = sphi %s4232_s25, %s5227_s25   ;;  %s4067_s24 = sphi %s4230_s24, %s5226_s24   ;;  %s4063_s30 = sphi %s4228_s30, %s5225_s30   ;;  %s4059_s4 = sphi %s4226_s4, %s5224_s4  }
  0x2b   : > { %s605_s1 = sshll.u32 %s4073_s5, 4  ;;  %s4247_s26 = sadd.s32 4294967295, %s4071_s25   ;;  %s4252_s1 = int_to_ptr.vmem [resolvable:$true] %s605_s1 }
  0x2c   : > { %5156 = sst [smem:[#allocation49_spill]] %s4247_s26  ;;  %p2636_p0 = scmp.ge.s32.totalorder %s4071_s25, 1 }
  0x2d   : > { %p5114_p1 = scmp.eq.s32.totalorder %s4247_s26, 0  ;;  %p593_p2 = scmp.lt.s32.totalorder %s4071_s25, 3 }
  0x2e   : > { %s4074_s6 = smov [#allocation8]   ;;  %s4075_s28 = smov [#allocation11]  }
  0x2f   : > { %p4254_p3 = pnand %p2636_p0, %p593_p2  ;;  %s629_s27 = sshll.u32 %s4074_s6, 4  ;;  %s4267_s27 = int_to_ptr.vmem [resolvable:$true] %s629_s27 }
  0x30   : > { %s4269_s29 = sshll.u32 %s4075_s28, 4  ;;  %s5160_s5 = sld [smem:[#allocation52_spill]]  ;;  %s654_s29 = int_to_ptr.vmem [resolvable:$true] %s4269_s29 }
  0x31   : > { %s5157_s2 = scalar_select %p4254_p3, 1, 0 }
  0x32   : > { %p3092_p5 = pneg %p4254_p3 }
  0x33   : > { %5158 = sst [smem:[#allocation50_spill]] %s5157_s2 }
  0x34   : > { %p4263_p6 = pnand %p3092_p5, %p5114_p1 }
  0x36   : > { %s3375_s19 = scalar_lea.hbm %s5160_s5, 2048  ;;  %p4279_p8 = pneg %p4263_p6 }
  0x37   : > { %p3376_p7 = scmp.ne.s32.totalorder %s5160_s5, %s3375_s19  ;;  %p3382_p11 = scmp.lt.u32.totalorder %s3375_s19, %s5160_s5 }
  0x39   : > { %p3378_p9 = pnand %p4279_p8, %p3376_p7 }
  0x3b   : > { %p3379_p10 = pneg %p3378_p9 }
  0x3d   : > { %p3384_p12 = pnand %p3382_p11, %p3379_p10 }
  0x3f   : > { %3387 = shalt.err (!%p3384_p12)
}
  0x40   : > { %s3388_s18 = scalar_lea.vmem %s4252_s1, 2048  ;;  %p3396_p5 = scmp.lt.s32.totalorder %s4252_s1, %s4252_s1 }
  0x41   : > { %p3389_p13 = scmp.ne.s32.totalorder %s4252_s1, %s3388_s18  ;;  %p3397_p4 = scmp.lt.s32.totalorder %s3388_s18, %s3388_s18 }
  0x43   : > { %p3391_p0 = pnand %p3389_p13, %p4279_p8  ;;  %p3398_p7 = por %p3397_p4, %p3396_p5 }
  0x45   : > { %p3392_p2 = pneg %p3391_p0 }
  0x47   : > { %p3399_p9 = pnand %p3398_p7, %p3392_p2 }
  0x49   : > { %3402 = shalt.err (!%p3399_p9)
}
  0x4a   : > { %s5110_s23 = smov 128   ;;  %s5112_s19 = smov 8  }
  0x4b   : > { %3095 = dma.hbm_to_vmem [thread:$0]  (!%p4263_p6), %s5160_s5, 2048, %s4252_s1, [#allocation6], %s5110_s23, %s5110_s23, %s5112_s19  }
  0x4c   : > { %s5162_s22 = sld [smem:[#allocation54_spill]] }
  0x52   : > { %s3403_s18 = scalar_lea.hbm %s5162_s22, 1024 }
  0x53   : > { %p3404_p4 = scmp.ne.s32.totalorder %s5162_s22, %s3403_s18  ;;  %p3410_p12 = scmp.lt.u32.totalorder %s3403_s18, %s5162_s22 }
  0x55   : > { %p3406_p10 = pnand %p3404_p4, %p4279_p8 }
  0x57   : > { %p3407_p11 = pneg %p3406_p10 }
  0x59   : > { %p3412_p13 = pnand %p3410_p12, %p3407_p11 }
  0x5b   : > { %3415 = shalt.err (!%p3412_p13)
}
  0x5c   : > { %s3416_s1 = scalar_lea.vmem %s4267_s27, 1024  ;;  %p3424_p7 = scmp.lt.s32.totalorder %s4267_s27, %s4267_s27 }
  0x5d   : > { %p3417_p0 = scmp.ne.s32.totalorder %s4267_s27, %s3416_s1  ;;  %p3425_p9 = scmp.lt.s32.totalorder %s3416_s1, %s3416_s1 }
  0x5f   : > { %p3419_p2 = pnand %p3417_p0, %p4279_p8  ;;  %p3426_p4 = por %p3425_p9, %p3424_p7 }
  0x61   : > { %p3420_p5 = pneg %p3419_p2 }
  0x63   : > { %p3427_p10 = pnand %p3426_p4, %p3420_p5 }
  0x65   : > { %3430 = shalt.err (!%p3427_p10)
}
  0x66   : > { %s5116_s17 = smov 64   ;;  %s5118_s20 = smov 4  }
  0x67   : > { %3101 = dma.hbm_to_vmem [thread:$0]  (!%p4263_p6), %s5162_s22, 1024, %s4267_s27, [#allocation9], %s5116_s17, %s5116_s17, %s5118_s20  }
  0x68   : > { %s5163_s0 = sld [smem:[#allocation56_spill]] }
  0x6e   : > { %s3431_s28 = scalar_lea.hbm %s5163_s0, 2048 }
  0x6f   : > { %p3432_p11 = scmp.ne.s32.totalorder %s5163_s0, %s3431_s28  ;;  %p3438_p0 = scmp.lt.u32.totalorder %s3431_s28, %s5163_s0 }
  0x71   : > { %p3434_p12 = pnand %p3432_p11, %p4279_p8 }
  0x73   : > { %p3435_p13 = pneg %p3434_p12 }
  0x75   : > { %p3440_p2 = pnand %p3438_p0, %p3435_p13 }
  0x77   : > { %3443 = shalt.err (!%p3440_p2)
}
  0x78   : > { %s3444_s26 = scalar_lea.vmem %s654_s29, 2048  ;;  %p3452_p4 = scmp.lt.s32.totalorder %s654_s29, %s654_s29 }
  0x79   : > { %p3445_p5 = scmp.ne.s32.totalorder %s654_s29, %s3444_s26  ;;  %p3453_p10 = scmp.lt.s32.totalorder %s3444_s26, %s3444_s26 }
  0x7b   : > { %p3447_p7 = pnand %p3445_p5, %p4279_p8  ;;  %p3454_p1 = por %p3453_p10, %p3452_p4 }
  0x7d   : > { %p3448_p9 = pneg %p3447_p7 }
  0x7f   : > { %p3455_p3 = pnand %p3454_p1, %p3448_p9 }
  0x81   : > { %3458 = shalt.err (!%p3455_p3)
}
  0x82   : > { %s5164_s27 = smov 8   ;;  %s5165_s2 = smov 128  }
  0x83   : > { %3107 = dma.hbm_to_vmem [thread:$0]  (!%p4263_p6), %s5163_s0, 2048, %s654_s29, [#allocation12], %s5165_s2, %s5165_s2, %s5164_s27  }
  0x84   : > { %s4080_s21 = smov [#allocation14]   ;;  %s4081_s28 = smov [#allocation17]  }
  0x85   : > { %s677_s3 = sshll.u32 %s4080_s21, 4  ;;  %s701_s18 = sshll.u32 %s4081_s28, 4  ;;  %s678_s3 = int_to_ptr.vmem [resolvable:$true] %s677_s3  ;;  %s702_s18 = int_to_ptr.vmem [resolvable:$true] %s701_s18 }
  0x86   : > { %s5166_s17 = sld [smem:[#allocation58_spill]] }
  0x8c   : > { %s3459_s20 = scalar_lea.hbm %s5166_s17, 1024 }
  0x8d   : > { %p3460_p1 = scmp.ne.s32.totalorder %s5166_s17, %s3459_s20  ;;  %p3466_p12 = scmp.lt.u32.totalorder %s3459_s20, %s5166_s17 }
  0x8f   : > { %p3462_p3 = pnand %p3460_p1, %p4279_p8 }
  0x91   : > { %p3463_p11 = pneg %p3462_p3 }
  0x93   : > { %p3468_p13 = pnand %p3466_p12, %p3463_p11 }
  0x95   : > { %3471 = shalt.err (!%p3468_p13)
}
  0x96   : > { %s3472_s29 = scalar_lea.vmem %s678_s3, 1024  ;;  %p3480_p7 = scmp.lt.s32.totalorder %s678_s3, %s678_s3 }
  0x97   : > { %p3473_p0 = scmp.ne.s32.totalorder %s678_s3, %s3472_s29  ;;  %p3481_p9 = scmp.lt.s32.totalorder %s3472_s29, %s3472_s29 }
  0x99   : > { %p3475_p2 = pnand %p3473_p0, %p4279_p8  ;;  %p3482_p4 = por %p3481_p9, %p3480_p7 }
  0x9b   : > { %p3476_p5 = pneg %p3475_p2 }
  0x9d   : > { %p3483_p10 = pnand %p3482_p4, %p3476_p5 }
  0x9f   : > { %3486 = shalt.err (!%p3483_p10)
}
  0xa0   : > { %s5167_s22 = smov 4   ;;  %s5168_s5 = smov 64  }
  0xa1   : > { %3113 = dma.hbm_to_vmem [thread:$0]  (!%p4263_p6), %s5166_s17, 1024, %s678_s3, [#allocation15], %s5168_s5, %s5168_s5, %s5167_s22  }
  0xa2   : > { %s5169_s9 = sld [smem:[#allocation60_spill]] }
  0xa8   : > { %s3487_s28 = scalar_lea.hbm %s5169_s9, 1024 }
  0xa9   : > { %p3488_p1 = scmp.ne.s32.totalorder %s5169_s9, %s3487_s28  ;;  %p3494_p12 = scmp.lt.u32.totalorder %s3487_s28, %s5169_s9 }
  0xab   : > { %p3490_p3 = pnand %p3488_p1, %p4279_p8 }
  0xad   : > { %p3491_p11 = pneg %p3490_p3 }
  0xaf   : > { %p3496_p13 = pnand %p3494_p12, %p3491_p11 }
  0xb1   : > { %3499 = shalt.err (!%p3496_p13)
}
  0xb2   : > { %s3500_s4 = scalar_lea.vmem %s702_s18, 1024  ;;  %p3508_p7 = scmp.lt.s32.totalorder %s702_s18, %s702_s18 }
  0xb3   : > { %p3501_p0 = scmp.ne.s32.totalorder %s702_s18, %s3500_s4  ;;  %p3509_p9 = scmp.lt.s32.totalorder %s3500_s4, %s3500_s4 }
  0xb5   : > { %p3503_p2 = pnand %p3501_p0, %p4279_p8  ;;  %p3510_p4 = por %p3509_p9, %p3508_p7 }
  0xb7   : > { %p3504_p5 = pneg %p3503_p2 }
  0xb9   : > { %p3511_p10 = pnand %p3510_p4, %p3504_p5 }
  0xbb   : > { %3514 = shalt.err (!%p3511_p10)
}
  0xbc   : > { %3119 = dma.hbm_to_vmem [thread:$0]  (!%p4263_p6), %s5169_s9, 1024, %s702_s18, [#allocation18], %s5168_s5, %s5168_s5, %s5167_s22  }
  0xbd   : > { %s4082_s19 = smov [#allocation20]   ;;  %s4083_s28 = smov [#allocation23]  }
  0xbe   : > { %s725_s21 = sshll.u32 %s4082_s19, 4  ;;  %s749_s1 = sshll.u32 %s4083_s28, 4  ;;  %s726_s21 = int_to_ptr.vmem [resolvable:$true] %s725_s21  ;;  %s750_s1 = int_to_ptr.vmem [resolvable:$true] %s749_s1 }
  0xbf   : > { %s5170_s11 = sld [smem:[#allocation62_spill]] }
  0xc5   : > { %s3515_s29 = scalar_lea.hbm %s5170_s11, 1024 }
  0xc6   : > { %p3516_p1 = scmp.ne.s32.totalorder %s5170_s11, %s3515_s29  ;;  %p3522_p12 = scmp.lt.u32.totalorder %s3515_s29, %s5170_s11 }
  0xc8   : > { %p3518_p3 = pnand %p3516_p1, %p4279_p8 }
  0xca   : > { %p3519_p11 = pneg %p3518_p3 }
  0xcc   : > { %p3524_p13 = pnand %p3522_p12, %p3519_p11 }
  0xce   : > { %3527 = shalt.err (!%p3524_p13)
}
  0xcf   : > { %s3528_s18 = scalar_lea.vmem %s726_s21, 1024  ;;  %p3536_p7 = scmp.lt.s32.totalorder %s726_s21, %s726_s21 }
  0xd0   : > { %p3529_p0 = scmp.ne.s32.totalorder %s726_s21, %s3528_s18  ;;  %p3537_p9 = scmp.lt.s32.totalorder %s3528_s18, %s3528_s18 }
  0xd2   : > { %p3531_p2 = pnand %p3529_p0, %p4279_p8  ;;  %p3538_p4 = por %p3537_p9, %p3536_p7 }
  0xd4   : > { %p3532_p5 = pneg %p3531_p2 }
  0xd6   : > { %p3539_p10 = pnand %p3538_p4, %p3532_p5 }
  0xd8   : > { %3542 = shalt.err (!%p3539_p10)
}
  0xd9   : > { %3125 = dma.hbm_to_vmem [thread:$0]  (!%p4263_p6), %s5170_s11, 1024, %s726_s21, [#allocation21], %s5168_s5, %s5168_s5, %s5167_s22  }
  0xda   : > { %s5171_s13 = sld [smem:[#allocation64_spill]] }
  0xe0   : > { %s3543_s28 = scalar_lea.hbm %s5171_s13, 2048 }
  0xe1   : > { %p3544_p1 = scmp.ne.s32.totalorder %s5171_s13, %s3543_s28  ;;  %p3550_p12 = scmp.lt.u32.totalorder %s3543_s28, %s5171_s13 }
  0xe3   : > { %p3546_p3 = pnand %p3544_p1, %p4279_p8 }
  0xe5   : > { %p3547_p11 = pneg %p3546_p3 }
  0xe7   : > { %p3552_p13 = pnand %p3550_p12, %p3547_p11 }
  0xe9   : > { %3555 = shalt.err (!%p3552_p13)
}
  0xea   : > { %s3556_s3 = scalar_lea.vmem %s750_s1, 2048  ;;  %p3564_p7 = scmp.lt.s32.totalorder %s750_s1, %s750_s1 }
  0xeb   : > { %p3557_p0 = scmp.ne.s32.totalorder %s750_s1, %s3556_s3  ;;  %p3565_p9 = scmp.lt.s32.totalorder %s3556_s3, %s3556_s3 }
  0xed   : > { %p3559_p2 = pnand %p3557_p0, %p4279_p8  ;;  %p3566_p4 = por %p3565_p9, %p3564_p7 }
  0xef   : > { %p3560_p5 = pneg %p3559_p2 }
  0xf1   : > { %p3567_p10 = pnand %p3566_p4, %p3560_p5 }
  0xf3   : > { %3570 = shalt.err (!%p3567_p10)
}
  0xf4   : > { %3131 = dma.hbm_to_vmem [thread:$0]  (!%p4263_p6), %s5171_s13, 2048, %s750_s1, [#allocation24], %s5165_s2, %s5165_s2, %s5164_s27  }
  0xf5   : > { %s4084_s17 = smov [#allocation26]   ;;  %s4085_s20 = smov [#allocation7]  }
  0xf6   : > { %s773_s0 = sshll.u32 %s4084_s17, 4  ;;  %s619_s19 = sshll.u32 %s4085_s20, 4  ;;  %s774_s0 = int_to_ptr.vmem [resolvable:$true] %s773_s0  ;;  %s620_s19 = int_to_ptr.vmem [resolvable:$true] %s619_s19 }
  0xf7   : > { %s5172_s15 = sld [smem:[#allocation66_spill]] }
  0xfd   : > { %s3571_s23 = scalar_lea.hbm %s5172_s15, 1024 }
  0xfe   : > { %p3572_p1 = scmp.ne.s32.totalorder %s5172_s15, %s3571_s23  ;;  %p3578_p12 = scmp.lt.u32.totalorder %s3571_s23, %s5172_s15 }
 0x100   : > { %p3574_p3 = pnand %p3572_p1, %p4279_p8 }
 0x102   : > { %p3575_p11 = pneg %p3574_p3 }
 0x104   : > { %p3580_p13 = pnand %p3578_p12, %p3575_p11 }
 0x106   : > { %3583 = shalt.err (!%p3580_p13)
}
 0x107   : > { %s3584_s27 = scalar_lea.vmem %s774_s0, 1024  ;;  %p3592_p7 = scmp.lt.s32.totalorder %s774_s0, %s774_s0 }
 0x108   : > { %p3585_p0 = scmp.ne.s32.totalorder %s774_s0, %s3584_s27  ;;  %p3593_p9 = scmp.lt.s32.totalorder %s3584_s27, %s3584_s27 }
 0x10a   : > { %p3587_p2 = pnand %p3585_p0, %p4279_p8  ;;  %p3594_p4 = por %p3593_p9, %p3592_p7 }
 0x10c   : > { %p3588_p5 = pneg %p3587_p2 }
 0x10e   : > { %p3595_p10 = pnand %p3594_p4, %p3588_p5 }
 0x110   : > { %3598 = shalt.err (!%p3595_p10)
}
 0x111   : > { %3137 = dma.hbm_to_vmem [thread:$0]  (!%p4263_p6), %s5172_s15, 1024, %s774_s0, [#allocation27], %s5168_s5, %s5168_s5, %s5167_s22  }
 0x112   : > { %s5173_s20 = sld [smem:[#allocation53_spill]] }
 0x118   : > { %s3599_s28 = scalar_lea.hbm %s5173_s20, 32 }
 0x119   : > { %p3600_p1 = scmp.ne.s32.totalorder %s5173_s20, %s3599_s28  ;;  %p3606_p12 = scmp.lt.u32.totalorder %s3599_s28, %s5173_s20 }
 0x11b   : > { %p3602_p3 = pnand %p3600_p1, %p4279_p8 }
 0x11d   : > { %p3603_p11 = pneg %p3602_p3 }
 0x11f   : > { %p3608_p13 = pnand %p3606_p12, %p3603_p11 }
 0x121   : > { %3611 = shalt.err (!%p3608_p13)
}
 0x122   : > { %s3612_s3 = scalar_lea.vmem %s620_s19, 32  ;;  %p3620_p7 = scmp.lt.s32.totalorder %s620_s19, %s620_s19 }
 0x123   : > { %p3613_p0 = scmp.ne.s32.totalorder %s620_s19, %s3612_s3  ;;  %p3621_p9 = scmp.lt.s32.totalorder %s3612_s3, %s3612_s3 }
 0x125   : > { %p3615_p2 = pnand %p3613_p0, %p4279_p8  ;;  %p3622_p4 = por %p3621_p9, %p3620_p7 }
 0x127   : > { %p3616_p5 = pneg %p3615_p2 }
 0x129   : > { %p3623_p10 = pnand %p3622_p4, %p3616_p5 }
 0x12b   : > { %3626 = shalt.err (!%p3623_p10)
}
 0x12c   : > { %3098 = dma.hbm_to_vmem [thread:$0]  (!%p4263_p6), %s5173_s20, 32, %s620_s19, [#allocation6]  }
 0x12d   : > { %s4086_s27 = smov [#allocation10]   ;;  %s4087_s1 = smov [#allocation13]  }
 0x12e   : > { %s643_s2 = sshll.u32 %s4086_s27, 4  ;;  %s667_s18 = sshll.u32 %s4087_s1, 4  ;;  %s644_s2 = int_to_ptr.vmem [resolvable:$true] %s643_s2  ;;  %s668_s18 = int_to_ptr.vmem [resolvable:$true] %s667_s18 }
 0x12f   : > { %s5174_s26 = sld [smem:[#allocation55_spill]] }
 0x135   : > { %s3627_s23 = scalar_lea.hbm %s5174_s26, 16 }
 0x136   : > { %p3628_p1 = scmp.ne.s32.totalorder %s5174_s26, %s3627_s23  ;;  %p3634_p12 = scmp.lt.u32.totalorder %s3627_s23, %s5174_s26 }
 0x138   : > { %p3630_p3 = pnand %p3628_p1, %p4279_p8 }
 0x13a   : > { %p3631_p11 = pneg %p3630_p3 }
 0x13c   : > { %p3636_p13 = pnand %p3634_p12, %p3631_p11 }
 0x13e   : > { %3639 = shalt.err (!%p3636_p13)
}
 0x13f   : > { %s3640_s19 = scalar_lea.vmem %s644_s2, 16  ;;  %s3647_s21 = scalar_lea.vmem %s644_s2, 32 }
 0x140   : > { %p3641_p0 = scmp.ne.s32.totalorder %s644_s2, %s3640_s19  ;;  %p3648_p7 = scmp.lt.s32.totalorder %s644_s2, %s644_s2 }
 0x141   : > { %p3649_p9 = scmp.lt.s32.totalorder %s3647_s21, %s3640_s19 }
 0x142   : > { %p3643_p2 = pnand %p3641_p0, %p4279_p8 }
 0x143   : > { %p3650_p4 = por %p3649_p9, %p3648_p7 }
 0x144   : > { %p3644_p5 = pneg %p3643_p2 }
 0x146   : > { %p3651_p10 = pnand %p3650_p4, %p3644_p5 }
 0x148   : > { %3654 = shalt.err (!%p3651_p10)
}
 0x149   : > { %3104 = dma.hbm_to_vmem [thread:$0]  (!%p4263_p6), %s5174_s26, 16, %s644_s2, [#allocation9]  }
 0x14a   : > { %s5175_s23 = sld [smem:[#allocation57_spill]] }
 0x150   : > { %s3655_s29 = scalar_lea.hbm %s5175_s23, 32 }
 0x151   : > { %p3656_p1 = scmp.ne.s32.totalorder %s5175_s23, %s3655_s29  ;;  %p3662_p12 = scmp.lt.u32.totalorder %s3655_s29, %s5175_s23 }
 0x153   : > { %p3658_p3 = pnand %p3656_p1, %p4279_p8 }
 0x155   : > { %p3659_p11 = pneg %p3658_p3 }
 0x157   : > { %p3664_p13 = pnand %p3662_p12, %p3659_p11 }
 0x159   : > { %3667 = shalt.err (!%p3664_p13)
}
 0x15a   : > { %s3668_s21 = scalar_lea.vmem %s668_s18, 32  ;;  %p3676_p7 = scmp.lt.s32.totalorder %s668_s18, %s668_s18 }
 0x15b   : > { %p3669_p0 = scmp.ne.s32.totalorder %s668_s18, %s3668_s21  ;;  %p3677_p9 = scmp.lt.s32.totalorder %s3668_s21, %s3668_s21 }
 0x15d   : > { %p3671_p2 = pnand %p3669_p0, %p4279_p8  ;;  %p3678_p4 = por %p3677_p9, %p3676_p7 }
 0x15f   : > { %p3672_p5 = pneg %p3671_p2 }
 0x161   : > { %p3679_p10 = pnand %p3678_p4, %p3672_p5 }
 0x163   : > { %3682 = shalt.err (!%p3679_p10)
}
 0x164   : > { %3110 = dma.hbm_to_vmem [thread:$0]  (!%p4263_p6), %s5175_s23, 32, %s668_s18, [#allocation12]  }
 0x165   : > { %s4088_s1 = smov [#allocation16]   ;;  %s4089_s28 = smov [#allocation19]  }
 0x166   : > { %s691_s17 = sshll.u32 %s4088_s1, 4  ;;  %s715_s29 = sshll.u32 %s4089_s28, 4  ;;  %s692_s17 = int_to_ptr.vmem [resolvable:$true] %s691_s17  ;;  %s716_s29 = int_to_ptr.vmem [resolvable:$true] %s715_s29 }
 0x167   : > { %s5176_s8 = sld [smem:[#allocation59_spill]] }
 0x16d   : > { %s3683_s0 = scalar_lea.hbm %s5176_s8, 16 }
 0x16e   : > { %p3684_p1 = scmp.ne.s32.totalorder %s5176_s8, %s3683_s0  ;;  %p3690_p12 = scmp.lt.u32.totalorder %s3683_s0, %s5176_s8 }
 0x170   : > { %p3686_p3 = pnand %p3684_p1, %p4279_p8 }
 0x172   : > { %p3687_p11 = pneg %p3686_p3 }
 0x174   : > { %p3692_p13 = pnand %p3690_p12, %p3687_p11 }
 0x176   : > { %3695 = shalt.err (!%p3692_p13)
}
 0x177   : > { %s3696_s18 = scalar_lea.vmem %s692_s17, 16  ;;  %s3703_s27 = scalar_lea.vmem %s692_s17, 32 }
 0x178   : > { %p3697_p0 = scmp.ne.s32.totalorder %s692_s17, %s3696_s18  ;;  %p3704_p7 = scmp.lt.s32.totalorder %s692_s17, %s692_s17 }
 0x179   : > { %p3705_p9 = scmp.lt.s32.totalorder %s3703_s27, %s3696_s18 }
 0x17a   : > { %p3699_p2 = pnand %p3697_p0, %p4279_p8 }
 0x17b   : > { %p3706_p4 = por %p3705_p9, %p3704_p7 }
 0x17c   : > { %p3700_p5 = pneg %p3699_p2 }
 0x17e   : > { %p3707_p10 = pnand %p3706_p4, %p3700_p5 }
 0x180   : > { %3710 = shalt.err (!%p3707_p10)
}
 0x181   : > { %3116 = dma.hbm_to_vmem [thread:$0]  (!%p4263_p6), %s5176_s8, 16, %s692_s17, [#allocation15]  }
 0x182   : > { %s5177_s10 = sld [smem:[#allocation61_spill]] }
 0x188   : > { %s3711_s3 = scalar_lea.hbm %s5177_s10, 16 }
 0x189   : > { %p3712_p1 = scmp.ne.s32.totalorder %s5177_s10, %s3711_s3  ;;  %p3718_p12 = scmp.lt.u32.totalorder %s3711_s3, %s5177_s10 }
 0x18b   : > { %p3714_p3 = pnand %p3712_p1, %p4279_p8 }
 0x18d   : > { %p3715_p11 = pneg %p3714_p3 }
 0x18f   : > { %p3720_p13 = pnand %p3718_p12, %p3715_p11 }
 0x191   : > { %3723 = shalt.err (!%p3720_p13)
}
 0x192   : > { %s3724_s18 = scalar_lea.vmem %s716_s29, 16  ;;  %s3731_s17 = scalar_lea.vmem %s716_s29, 32 }
 0x193   : > { %p3725_p0 = scmp.ne.s32.totalorder %s716_s29, %s3724_s18  ;;  %p3732_p7 = scmp.lt.s32.totalorder %s716_s29, %s716_s29 }
 0x194   : > { %p3733_p9 = scmp.lt.s32.totalorder %s3731_s17, %s3724_s18 }
 0x195   : > { %p3727_p2 = pnand %p3725_p0, %p4279_p8 }
 0x196   : > { %p3734_p4 = por %p3733_p9, %p3732_p7 }
 0x197   : > { %p3728_p5 = pneg %p3727_p2 }
 0x199   : > { %p3735_p10 = pnand %p3734_p4, %p3728_p5 }
 0x19b   : > { %3738 = shalt.err (!%p3735_p10)
}
 0x19c   : > { %3122 = dma.hbm_to_vmem [thread:$0]  (!%p4263_p6), %s5177_s10, 16, %s716_s29, [#allocation18]  }
 0x19d   : > { %s4090_s28 = smov [#allocation22]   ;;  %s4091_s4 = smov [#allocation25]  }
 0x19e   : > { %s739_s9 = sshll.u32 %s4090_s28, 4  ;;  %s763_s3 = sshll.u32 %s4091_s4, 4  ;;  %s740_s9 = int_to_ptr.vmem [resolvable:$true] %s739_s9  ;;  %s764_s3 = int_to_ptr.vmem [resolvable:$true] %s763_s3 }
 0x19f   : > { %s5178_s12 = sld [smem:[#allocation63_spill]] }
 0x1a5   : > { %s3739_s21 = scalar_lea.hbm %s5178_s12, 16 }
 0x1a6   : > { %p3740_p1 = scmp.ne.s32.totalorder %s5178_s12, %s3739_s21  ;;  %p3746_p12 = scmp.lt.u32.totalorder %s3739_s21, %s5178_s12 }
 0x1a8   : > { %p3742_p3 = pnand %p3740_p1, %p4279_p8 }
 0x1aa   : > { %p3743_p11 = pneg %p3742_p3 }
 0x1ac   : > { %p3748_p13 = pnand %p3746_p12, %p3743_p11 }
 0x1ae   : > { %3751 = shalt.err (!%p3748_p13)
}
 0x1af   : > { %s3752_s29 = scalar_lea.vmem %s740_s9, 16  ;;  %s3759_s1 = scalar_lea.vmem %s740_s9, 32 }
 0x1b0   : > { %p3753_p0 = scmp.ne.s32.totalorder %s740_s9, %s3752_s29  ;;  %p3760_p7 = scmp.lt.s32.totalorder %s740_s9, %s740_s9 }
 0x1b1   : > { %p3761_p9 = scmp.lt.s32.totalorder %s3759_s1, %s3752_s29 }
 0x1b2   : > { %p3755_p2 = pnand %p3753_p0, %p4279_p8 }
 0x1b3   : > { %p3762_p4 = por %p3761_p9, %p3760_p7 }
 0x1b4   : > { %p3756_p5 = pneg %p3755_p2 }
 0x1b6   : > { %p3763_p10 = pnand %p3762_p4, %p3756_p5 }
 0x1b8   : > { %3766 = shalt.err (!%p3763_p10)
}
 0x1b9   : > { %3128 = dma.hbm_to_vmem [thread:$0]  (!%p4263_p6), %s5178_s12, 16, %s740_s9, [#allocation21]  }
 0x1ba   : > { %s5179_s14 = sld [smem:[#allocation65_spill]] }
 0x1c0   : > { %s3767_s21 = scalar_lea.hbm %s5179_s14, 32 }
 0x1c1   : > { %p3768_p1 = scmp.ne.s32.totalorder %s5179_s14, %s3767_s21  ;;  %p3774_p12 = scmp.lt.u32.totalorder %s3767_s21, %s5179_s14 }
 0x1c3   : > { %p3770_p3 = pnand %p3768_p1, %p4279_p8 }
 0x1c5   : > { %p3771_p11 = pneg %p3770_p3 }
 0x1c7   : > { %p3776_p13 = pnand %p3774_p12, %p3771_p11 }
 0x1c9   : > { %3779 = shalt.err (!%p3776_p13)
}
 0x1ca   : > { %s3780_s29 = scalar_lea.vmem %s764_s3, 32  ;;  %p3788_p7 = scmp.lt.s32.totalorder %s764_s3, %s764_s3 }
 0x1cb   : > { %p3781_p0 = scmp.ne.s32.totalorder %s764_s3, %s3780_s29  ;;  %p3789_p9 = scmp.lt.s32.totalorder %s3780_s29, %s3780_s29 }
 0x1cd   : > { %p3783_p2 = pnand %p3781_p0, %p4279_p8  ;;  %p3790_p4 = por %p3789_p9, %p3788_p7 }
 0x1cf   : > { %p3784_p5 = pneg %p3783_p2 }
 0x1d1   : > { %p3791_p10 = pnand %p3790_p4, %p3784_p5 }
 0x1d3   : > { %3794 = shalt.err (!%p3791_p10)
}
 0x1d4   : > { %3134 = dma.hbm_to_vmem [thread:$0]  (!%p4263_p6), %s5179_s14, 32, %s764_s3, [#allocation24]  }
 0x1d5   : > { %s4092_s28 = smov [#allocation28]   ;;  %s5180_s16 = sld [smem:[#allocation67_spill]] }
 0x1d6   : > { %s787_s4 = sshll.u32 %s4092_s28, 4  ;;  %s788_s4 = int_to_ptr.vmem [resolvable:$true] %s787_s4 }
 0x1db   : > { %s3795_s21 = scalar_lea.hbm %s5180_s16, 16 }
 0x1dc   : > { %p3796_p1 = scmp.ne.s32.totalorder %s5180_s16, %s3795_s21  ;;  %p3802_p12 = scmp.lt.u32.totalorder %s3795_s21, %s5180_s16 }
 0x1de   : > { %p3798_p3 = pnand %p3796_p1, %p4279_p8 }
 0x1e0   : > { %p3799_p11 = pneg %p3798_p3 }
 0x1e2   : > { %p3804_p13 = pnand %p3802_p12, %p3799_p11 }
 0x1e4   : > { %3807 = shalt.err (!%p3804_p13)
}
 0x1e5   : > { %s3808_s3 = scalar_lea.vmem %s788_s4, 16  ;;  %s3815_s29 = scalar_lea.vmem %s788_s4, 32 }
 0x1e6   : > { %p3809_p0 = scmp.ne.s32.totalorder %s788_s4, %s3808_s3  ;;  %p3816_p7 = scmp.lt.s32.totalorder %s788_s4, %s788_s4 }
 0x1e7   : > { %p3817_p9 = scmp.lt.s32.totalorder %s3815_s29, %s3808_s3 }
 0x1e8   : > { %p3811_p2 = pnand %p3809_p0, %p4279_p8 }
 0x1e9   : > { %p3818_p4 = por %p3817_p9, %p3816_p7 }
 0x1ea   : > { %p3812_p5 = pneg %p3811_p2 }
 0x1ec   : > { %p3819_p10 = pnand %p3818_p4, %p3812_p5 }
 0x1ee   : > { %3822 = shalt.err (!%p3819_p10)
}
 0x1ef   : > { %s5181_s6 = sld [smem:[#allocation48_spill]]  ;;  %s5182_s28 = sld [smem:[#allocation49_spill]] }
 0x1f0   : > { %3140 = dma.hbm_to_vmem [thread:$0]  (!%p4263_p6), %s5180_s16, 16, %s788_s4, [#allocation27]  }
 0x1f1   : > { %s5124_s7 = sadd.s32 4294967294, %s4071_s25   ;;  %s4602_s0 = sadd.s32 1, %s4071_s25  }
 0x1f2   : > { %s58_s19 = ssub.s32 %s4071_s25, %s4602_s0  ;;  %s61_s21 = sadd.s32 1, %s4067_s24 }
 0x1f3   : > { %p59_p8 = scmp.eq.s32.totalorder %s58_s19, 0  ;;  %p68_p1 = scmp.ne.s32.totalorder %s4067_s24, %s4063_s30 }
 0x1f4   : > { %p69_p3 = scmp.eq.s32.totalorder %s4071_s25, 0  ;;  %p482_p2 = scmp.eq.s32.totalorder %s5124_s7, 1 }
 0x1f5   : > { %p74_p11 = scmp.ne.s32.totalorder %s4063_s30, %s5181_s6  ;;  %p5184_p13 = scmp.eq.s32.totalorder %s5182_s28, 0 }
 0x1f6   : > { %s4613_s2 = scalar_select %p59_p8, %s4067_s24, %s61_s21  }
 0x1f7   : > { %p4615_p12 = por %p69_p3, %p68_p1  ;;  %p4621_p6 = por %p5184_p13, %p74_p11 }
 0x1f8   : > { %p476_p0 = scmp.eq.s32.totalorder %s5182_s28, 1  ;;  %p3177_p5 = scmp.lt.s32.totalorder %s4071_s25, 2 }
 0x1f9   : > { %s804_s17 = sand.u32 1, %s4067_s24   ;;  %p4634_p9 = por %p482_p2, %p74_p11 }
 0x1fa   : > { %p4630_p7 = por %p476_p0, %p68_p1  ;;  %s2654_s29 = sshll.u32 %s804_s17, 3 }
 0x1fb   : > { %s5187_s3 = scalar_select %p4634_p9, 1, 0 }
 0x1fc   : > { %s5186_s27 = scalar_select %p4630_p7, 1, 0 }
 0x1fd   : > { %s2808_s9 = sshll.u32 %s4071_s25, 7  ;;  %s5188_s19 = sld [smem:[#allocation51_spill]] }
 0x1fe   : > { %s808_s28 = scalar_lea.vmem [#allocation2], %s2654_s29  ;;  %p4648_p4 = pnand %p3177_p5, %p4615_p12 }
 0x1ff   : > { %s815_s7 = sshll.u32 %s808_s28, 4  ;;  %s4652_s10 = scalar_lea.sflag [#allocation3], %s804_s17  ;;  %s4644_s7 = int_to_ptr.vmem [resolvable:$true] %s815_s7 }
 0x200   : > { %p3825_p8 = pneg %p4648_p4 }
 0x203   : > { %s4642_s21 = scalar_lea.hbm %s5188_s19, %s2808_s9  ;;  %s3828_s18 = scalar_lea.hbm %s5188_s19, 256 }
 0x204   : > { %s3823_s1 = scalar_lea.hbm %s4642_s21, 128  ;;  %p3829_p11 = scmp.lt.u32.totalorder %s4642_s21, %s5188_s19 }
 0x205   : > { %p3824_p10 = scmp.ne.s32.totalorder %s4642_s21, %s3823_s1  ;;  %p3830_p12 = scmp.lt.u32.totalorder %s3828_s18, %s3823_s1 }
 0x206   : > { %p3832_p0 = scmp.lt.u32.totalorder %s3823_s1, %s4642_s21 }
 0x207   : > { %p3826_p1 = pnand %p3825_p8, %p3824_p10  ;;  %p3831_p13 = por %p3830_p12, %p3829_p11 }
 0x209   : > { %p3827_p3 = pneg %p3826_p1  ;;  %p3833_p2 = por %p3832_p0, %p3831_p13 }
 0x20b   : > { %p3834_p5 = pnand %p3833_p2, %p3827_p3 }
 0x20d   : > { %3837 = shalt.err (!%p3834_p5)
}
 0x20e   : > { %s3838_s17 = scalar_lea.vmem %s4644_s7, 128  ;;  %s4093_s29 = smov [#allocation2]  }
 0x20f   : > { %p3839_p10 = scmp.ne.s32.totalorder %s4644_s7, %s3838_s17  ;;  %s3843_s9 = sshll.u32 %s4093_s29, 4  ;;  %s3844_s9 = int_to_ptr.vmem [resolvable:$false] %s3843_s9 }
 0x210   : > { %s3845_s6 = scalar_lea.vmem %s3844_s9, 256  ;;  %p3846_p7 = scmp.lt.s32.totalorder %s4644_s7, %s3844_s9 }
 0x211   : > { %p3841_p1 = pnand %p3839_p10, %p3825_p8  ;;  %p3847_p11 = scmp.lt.s32.totalorder %s3845_s6, %s3838_s17 }
 0x213   : > { %p3842_p9 = pneg %p3841_p1  ;;  %p3848_p12 = por %p3847_p11, %p3846_p7 }
 0x215   : > { %p3849_p13 = pnand %p3848_p12, %p3842_p9 }
 0x217   : > { %3852 = shalt.err (!%p3849_p13)
}
 0x218   : > { %3144 = dma.hbm_to_vmem [thread:$0]  (!%p4648_p4), %s4642_s21, 128, %s4644_s7, %s4652_s10, %s5168_s5, %s5168_s5, %s5167_s22  }
 0x219   : > { %s5190_s1 = sld [smem:[#allocation50_spill]] }
 0x21f   : > { %p5191_p8 = scmp.ne.s32.totalorder %s5190_s1, 0 }
 0x220   : > { %s4686_s18 = sand.u32 (!%p5191_p8), 1, %s4063_s30  }
 0x221   : > { %827 = sbr.rel (%p5191_p8) target bundleno = 2617 (0xa39), region = 96  ;;  %s4689_s28 = sshll.u32 (!%p5191_p8), %s4686_s18, 3 }
 0x222   : > { %s830_s8 = scalar_lea.sflag (!%p5191_p8), [#allocation3], %s4686_s18  ;;  %s833_s17 = scalar_lea.vmem (!%p5191_p8), [#allocation2], %s4689_s28 }
 0x228   : > { %4010 = dma.done.wait (%p4621_p6), %s830_s8, 128  }
 0x229   : > { %4012 = vsyncadd (%p4621_p6), %s830_s8, 4294967168  ;;  %s5192_s10 = sld [smem:[#allocation49_spill]] }
 0x22f   : > { %p5193_p7 = scmp.eq.s32.totalorder %s5192_s10, 0 }
 0x231   : > { %4014 = dma.done.wait (%p5193_p7), [#allocation6], 2080   ;;  %p5194_p9 = pmov %p5193_p7 }
 0x232   : > { %p5195_p4 = pmov %p5193_p7 }
 0x233   : > { %4016 = vsyncadd (%p5194_p9), [#allocation6], 4294965216 }
 0x234   : > { %4018 = dma.done.wait (%p5195_p4), [#allocation9], 1040   ;;  %p5196_p3 = pmov %p5195_p4 }
 0x236   : > { %4020 = vsyncadd (%p5196_p3), [#allocation9], 4294966256  ;;  %p5197_p0 = pmov %p5196_p3 }
 0x238   : > { %4022 = dma.done.wait (%p5197_p0), [#allocation12], 2080   ;;  %p5198_p2 = pmov %p5197_p0 }
 0x239   : > { %p5199_p6 = pmov %p5197_p0 }
 0x23a   : > { %4024 = vsyncadd (%p5198_p2), [#allocation12], 4294965216 }
 0x23b   : > { %4026 = dma.done.wait (%p5199_p6), [#allocation15], 1040   ;;  %p5200_p5 = pmov %p5197_p0 }
 0x23c   : > { %p5201_p10 = pmov %p5197_p0 }
 0x23d   : > { %4028 = vsyncadd (%p5200_p5), [#allocation15], 4294966256 }
 0x23e   : > { %4030 = dma.done.wait (%p5201_p10), [#allocation18], 1040   ;;  %p5202_p1 = pmov %p5197_p0 }
 0x23f   : > { %p5203_p11 = pmov %p5197_p0 }
 0x240   : > { %4032 = vsyncadd (%p5202_p1), [#allocation18], 4294966256 }
 0x241   : > { %4034 = dma.done.wait (%p5203_p11), [#allocation21], 1040   ;;  %p5204_p12 = pmov %p5197_p0 }
 0x242   : > { %p5205_p13 = pmov %p5197_p0 }
 0x243   : > { %4036 = vsyncadd (%p5204_p12), [#allocation21], 4294966256 }
 0x244   : > { %4038 = dma.done.wait (%p5205_p13), [#allocation24], 2080   ;;  %p5206_p8 = pmov %p5197_p0 }
 0x245   : > { %p5207_p7 = pmov %p5197_p0 }
 0x246   : > { %4040 = vsyncadd (%p5206_p8), [#allocation24], 4294965216 }
 0x247   : > { %4042 = dma.done.wait (%p5207_p7), [#allocation27], 1040   ;;  %p5208_p9 = pmov %p5197_p0 }
 0x248   : > { %v4094_v0 = vmov 0   ;;  %v4095_v1 = vmov 0.0   ;;  %v3254_v2 = vld [vmem:[#allocation5 + $0x4] ss:$8 sps:$4 sm:$0xff]   ;;  %v3256_v3 = vld [vmem:[#allocation5] ss:$8 sps:$4 sm:$0xff]   ;;  %v1007_v39 = vlaneseq }
 0x249   : > { %4044 = vsyncadd (%p5208_p9), [#allocation27], 4294966256  ;;  %1135 = vmatprep.mubr.bf16.mxu0 %v4094_v0  ;;  %2896 = vmatprep.subr.bf16.mxu1 %v4095_v1  ;;  %v3257_v4 = vld [vmem:[#allocation5 + $0x14] ss:$8 sps:$4 sm:$0xff]   ;;  %v3259_v5 = vld [vmem:[#allocation5 + $0x10] ss:$8 sps:$4 sm:$0xff]  }
 0x24a   : > { %1103 = vmatprep.subr.bf16.mxu0 %v3254_v2  ;;  %v3260_v6 = vld [vmem:[#allocation5 + $0x24] ss:$8 sps:$4 sm:$0xff]   ;;  %v3262_v7 = vld [vmem:[#allocation5 + $0x20] ss:$8 sps:$4 sm:$0xff]   ;;  %v3263_v8 = vld [vmem:[#allocation5 + $0x34] ss:$8 sps:$4 sm:$0xff]  }
 0x24b   : > { %1104 = vmatpush1.bf16.msra.mxu0 %v3256_v3  ;;  %v3265_v9 = vld [vmem:[#allocation5 + $0x30] ss:$8 sps:$4 sm:$0xff]   ;;  %v3266_v10 = vld [vmem:[#allocation5 + $0x44] ss:$8 sps:$4 sm:$0xff]   ;;  %v3268_v13 = vld [vmem:[#allocation5 + $0x40] ss:$8 sps:$4 sm:$0xff]  }
 0x24c   : > { %1105 = vmatprep.subr.bf16.mxu0 %v3257_v4  ;;  %v3279_v11 = vld [vmem:[#allocation8] sm:$0xff]   ;;  %v3280_v12 = vld [vmem:[#allocation8 + $0x8] sm:$0xff]   ;;  %v3269_v14 = vld [vmem:[#allocation5 + $0x54] ss:$8 sps:$4 sm:$0xff]   ;;  %vm4096_vm0 = vmmov 0   ;;  %v1008_v40 = vshrl.u32 %v1007_v39, 7 }
 0x24d   : > { %2897 = vmatpush3.bf16.msra.mxu1 %v3279_v11  ;;  %v3271_v15 = vld [vmem:[#allocation5 + $0x50] ss:$8 sps:$4 sm:$0xff]   ;;  %v3272_v17 = vld [vmem:[#allocation5 + $0x64] ss:$8 sps:$4 sm:$0xff]   ;;  %v3274_v19 = vld [vmem:[#allocation5 + $0x60] ss:$8 sps:$4 sm:$0xff]   ;;  %2912 = vmatprep.mubr.msk.bf16.mxu1 %vm4096_vm0, %v4095_v1 }
 0x24e   : > { %2898 = vmatprep.subr.bf16.mxu1 %v4095_v1  ;;  %v3281_v16 = vld [vmem:[#allocation8 + $0x10] sm:$0xff]   ;;  %v3282_v18 = vld [vmem:[#allocation8 + $0x18] sm:$0xff]   ;;  %v3283_v21 = vld [vmem:[#allocation8 + $0x20] sm:$0xff]   ;;  %v4744_v41 = vsub.s32 0, %v1008_v40  ;;  %v4756_v63 = vsub.s32 1, %v1008_v40  ;;  %s958_s22 = scalar_lea.vmem [#allocation30], %s4689_s28 }
 0x24f   : > { %1106 = vmatpush1.bf16.msra.mxu0 %v3259_v5  ;;  %v3275_v20 = vld [vmem:[#allocation5 + $0x74] ss:$8 sps:$4 sm:$0xff]   ;;  %v3277_v22 = vld [vmem:[#allocation5 + $0x70] ss:$8 sps:$4 sm:$0xff]   ;;  %v3287_v27 = vld [vmem:[#allocation11] ss:$8 sps:$4 sm:$0xff]  }
 0x250   : > { %1107 = vmatprep.subr.bf16.mxu0 %v3260_v6  ;;  %v3278_v23 = vld [vmem:[%s833_s17] sm:$0xff]   ;;  %v3293_v32 = vld [vmem:[#allocation11 + $0x20] ss:$8 sps:$4 sm:$0xff]   ;;  %v1005_v42 = vld [vmem:[#allocation7] sm:$0x3]  ;;  %s965_s5 = scalar_lea.vmem [#allocation32], %s4689_s28 }
 0x251   : > { %2899 = vmatpush3.bf16.msra.mxu1 %v3280_v12  ;;  %v3284_v24 = vld [vmem:[#allocation8 + $0x28] sm:$0xff]   ;;  %v3285_v25 = vld [vmem:[#allocation8 + $0x30] sm:$0xff]   ;;  %v3286_v26 = vld [vmem:[#allocation8 + $0x38] sm:$0xff]   ;;  %v1010_v43 = vrot.slane %v1005_v42, %v4744_v41  ;;  %v1014_v2 = vrot.slane %v1005_v42, %v4756_v63  ;;  %s5126_s7 = scalar_lea.vmem [#allocation33], %s4689_s28  ;;  %s5209_s29 = sld [smem:[#allocation68_spill]] }
 0x252   : > { %2900 = vmatprep.subr.bf16.mxu1 %v4095_v1  ;;  %v3289_v28 = vld [vmem:[#allocation11 + $0x4] ss:$8 sps:$4 sm:$0xff]   ;;  %v3292_v29 = vld [vmem:[#allocation11 + $0x14] ss:$8 sps:$4 sm:$0xff]   ;;  %v3290_v30 = vld [vmem:[#allocation11 + $0x10] ss:$8 sps:$4 sm:$0xff]  }
 0x253   : > { %1108 = vmatpush1.bf16.msra.mxu0 %v3262_v7  ;;  %v3295_v31 = vld [vmem:[#allocation11 + $0x24] ss:$8 sps:$4 sm:$0xff]   ;;  %v3298_v33 = vld [vmem:[#allocation11 + $0x34] ss:$8 sps:$4 sm:$0xff]   ;;  %v3296_v34 = vld [vmem:[#allocation11 + $0x30] ss:$8 sps:$4 sm:$0xff]  }
 0x254   : > { %1109 = vmatprep.subr.bf16.mxu0 %v3263_v8  ;;  %v3301_v35 = vld [vmem:[#allocation11 + $0x44] ss:$8 sps:$4 sm:$0xff]   ;;  %v3299_v36 = vld [vmem:[#allocation11 + $0x40] ss:$8 sps:$4 sm:$0xff]   ;;  %v3304_v37 = vld [vmem:[#allocation11 + $0x54] ss:$8 sps:$4 sm:$0xff]  }
 0x255   : > { %2901 = vmatpush3.bf16.msra.mxu1 %v3281_v16  ;;  %v3302_v38 = vld [vmem:[#allocation11 + $0x50] ss:$8 sps:$4 sm:$0xff]   ;;  %v3307_v53 = vld [vmem:[#allocation11 + $0x64] ss:$8 sps:$4 sm:$0xff]   ;;  %v3305_v54 = vld [vmem:[#allocation11 + $0x60] ss:$8 sps:$4 sm:$0xff]  }
 0x256   : > { %2902 = vmatprep.subr.bf16.mxu1 %v4095_v1  ;;  %v3310_v55 = vld [vmem:[#allocation11 + $0x74] ss:$8 sps:$4 sm:$0xff]   ;;  %v3308_v56 = vld [vmem:[#allocation11 + $0x70] ss:$8 sps:$4 sm:$0xff]   ;;  %v3311_v57 = vld [vmem:[#allocation14] sm:$0xff]   ;;  %s5127_s4 = scalar_lea.vmem [#allocation35], %s4689_s28 }
 0x257   : > { %1110 = vmatpush1.bf16.msra.mxu0 %v3265_v9  ;;  %v3312_v58 = vld [vmem:[#allocation14 + $0x8] sm:$0xff]   ;;  %v3313_v59 = vld [vmem:[#allocation14 + $0x10] sm:$0xff]   ;;  %v3314_v60 = vld [vmem:[#allocation14 + $0x18] sm:$0xff]   ;;  %s5128_s21 = sand.u32 1, %s5192_s10   ;;  %s4860_s9 = sshll.u32 %s5192_s10, 7 }
 0x258   : > { %1111 = vmatprep.subr.bf16.mxu0 %v3266_v10  ;;  %v3315_v61 = vld [vmem:[#allocation14 + $0x20] sm:$0xff]   ;;  %v3316_v62 = vld [vmem:[#allocation14 + $0x28] sm:$0xff]   ;;  %v2697_v3 = vld [vmem:[#allocation10] ss:$0 sm:$0xff]  ;;  %s2240_s6 = sshll.u32 %s958_s22, 4  ;;  %s5210_s17 = sld [smem:[#allocation71_spill]]  ;;  %s4870_s6 = int_to_ptr.vmem [resolvable:$true] %s2240_s6 }
 0x259   : > { %2903 = vmatpush3.bf16.msra.mxu1 %v3282_v18  ;;  %v3318_v18 = vld [vmem:[#allocation14 + $0x38] sm:$0xff]   ;;  %v3328_v39 = vld [vmem:[#allocation20 + $0x8] sm:$0xff]   ;;  %p5211_p3 = scmp.ne.s32.totalorder %s5186_s27, 0  ;;  %s4097_s12 = smov [#allocation30]  }
 0x25a   : > { %2904 = vmatprep.subr.bf16.mxu1 %v4095_v1  ;;  %v3329_v40 = vld [vmem:[#allocation20 + $0x10] sm:$0xff]   ;;  %v3330_v42 = vld [vmem:[#allocation20 + $0x18] sm:$0xff]  }
 0x25b   : > { %1112 = vmatpush1.bf16.msra.mxu0 %v3268_v13 }
 0x25c   : > { %1113 = vmatprep.subr.bf16.mxu0 %v3269_v14 }
 0x25d   : > { %2905 = vmatpush3.bf16.msra.mxu1 %v3283_v21  ;;  %v3321_v21 = vld [vmem:[#allocation17 + $0x10] sm:$0xff]  }
 0x25e   : > { %2906 = vmatprep.subr.bf16.mxu1 %v4095_v1  ;;  %s4868_s11 = scalar_lea.hbm %s5210_s17, %s4860_s9 }
 0x25f   : > { %1114 = vmatpush1.bf16.msra.mxu0 %v3271_v15 }
 0x260   : > { %1115 = vmatprep.subr.bf16.mxu0 %v3272_v17  ;;  %v3317_v17 = vld [vmem:[#allocation14 + $0x30] sm:$0xff]  }
 0x261   : > { %2907 = vmatpush3.bf16.msra.mxu1 %v3284_v24  ;;  %v1291_v24 = vld [vmem:[#allocation13] sm:$0x3] }
 0x262   : > { %2908 = vmatprep.subr.bf16.mxu1 %v4095_v1 }
 0x263   : > { %1116 = vmatpush1.bf16.msra.mxu0 %v3274_v19  ;;  %v3319_v19 = vld [vmem:[#allocation17] sm:$0xff]  }
 0x264   : > { %1117 = vmatprep.subr.bf16.mxu0 %v3275_v20  ;;  %v3320_v20 = vld [vmem:[#allocation17 + $0x8] sm:$0xff]  }
 0x265   : > { %2909 = vmatpush3.bf16.msra.mxu1 %v3285_v25  ;;  %v1296_v25 = vrot.slane %v1291_v24, %v4744_v41 }
 0x266   : > { %2910 = vmatprep.subr.bf16.mxu1 %v4095_v1 }
 0x267   : > { %1118 = vmatpush1.bf16.msra.mxu0 %v3277_v22  ;;  %v3322_v22 = vld [vmem:[#allocation17 + $0x18] sm:$0xff]  }
 0x268   : > { %1383 = vmatprep.subr.bf16.mxu0 %v3289_v28 }
 0x269   : > { %2911 = vmatpush3.bf16.msra.mxu1 %v3286_v26 }
 0x26a   : > { %1136 = vmatmul.mubr.bf16.vlgmr.msra.gmra.mrb[0].mxu0 %v3278_v23  ;;  %2916 = vmatprep.subr.bf16.mxu1 %v4095_v1  ;;  %v3323_v23 = vld [vmem:[#allocation17 + $0x20] sm:$0xff]  }
 0x26b   : > { %1415 = vmatprep.mubr.bf16.mxu0 %v4094_v0  ;;  %1384 = vmatpush1.bf16.msra.mxu0 %v3287_v27 }
 0x26c   : > { %1385 = vmatprep.subr.bf16.mxu0 %v3292_v29 }
 0x26f   : > { %1386 = vmatpush1.bf16.msra.mxu0 %v3290_v30 }
 0x270   : > { %1387 = vmatprep.subr.bf16.mxu0 %v3295_v31 }
 0x273   : > { %1388 = vmatpush1.bf16.msra.mxu0 %v3293_v32 }
 0x274   : > { %1389 = vmatprep.subr.bf16.mxu0 %v3298_v33 }
 0x277   : > { %1390 = vmatpush1.bf16.msra.mxu0 %v3296_v34 }
 0x278   : > { %1391 = vmatprep.subr.bf16.mxu0 %v3301_v35  ;;  %v3324_v35 = vld [vmem:[#allocation17 + $0x28] sm:$0xff]  }
 0x27b   : > { %1392 = vmatpush1.bf16.msra.mxu0 %v3299_v36  ;;  %v3325_v36 = vld [vmem:[#allocation17 + $0x30] sm:$0xff]  }
 0x27c   : > { %1393 = vmatprep.subr.bf16.mxu0 %v3304_v37  ;;  %v3326_v37 = vld [vmem:[#allocation17 + $0x38] sm:$0xff]  }
 0x27f   : > { %1394 = vmatpush1.bf16.msra.mxu0 %v3302_v38  ;;  %v3327_v38 = vld [vmem:[#allocation20] sm:$0xff]  }
 0x280   : > { %1395 = vmatprep.subr.bf16.mxu0 %v3307_v53 }
 0x283   : > { %1396 = vmatpush1.bf16.msra.mxu0 %v3305_v54 }
 0x284   : > { %1397 = vmatprep.subr.bf16.mxu0 %v3310_v55 }
 0x287   : > { %1398 = vmatpush1.bf16.msra.mxu0 %v3308_v56 }
 0x288   : > { %2936 = vmatprep.subr.bf16.mxu0 %v4095_v1 }
 0x33d   : > { %v1137_v44 = vpop.f32.mrb[0].mxu0 }
 0x33e   : > { %v1138_v45 = vadd.f32 %v1137_v44, %v1010_v43  ;;  %v1139_v46 = vpop.f32.mrb[1].mxu0  ;;  %v3332_v44 = vld [vmem:[#allocation20 + $0x28] sm:$0xff]  }
 0x33f   : > { %v1141_v47 = vpop.f32.mrb[2].mxu0  ;;  %v1140_v5 = vadd.f32 %v1139_v46, %v1014_v2  ;;  %v2724_v46 = vld [vmem:[#allocation16] ss:$0 sm:$0xff] }
 0x340   : > { %v1142_v48 = vadd.f32 %v1141_v47, %v1010_v43  ;;  %v1143_v49 = vpop.f32.mrb[3].mxu0  ;;  %v1146_v50 = vmax.f32 %v1138_v45, 0.0  ;;  %v3331_v43 = vld [vmem:[#allocation20 + $0x20] sm:$0xff]   ;;  %v1300_v45 = vrot.slane %v1291_v24, %v4756_v63 }
 0x341   : > { %v1144_v9 = vadd.f32 %v1143_v49, %v1014_v2  ;;  %v3337_v2 = vld [vmem:[#allocation23 + $0x4] ss:$8 sps:$4 sm:$0xff]   ;;  %v3358_v24 = vld [vmem:[#allocation23 + $0x74] ss:$8 sps:$4 sm:$0xff]  }
 0x342   : > { %v1147_v51 = vmax.f32 %v1142_v48, 0.0 }
 0x344   : > { %v1148_v52 = vpack.c.bf16 %v1147_v51, %v1146_v50 }
 0x346   : > { %2913 = vmatmul.mubr.bf16.vlgmr.msra.gmra.mrb[0].mxu1 %v1148_v52 }
 0x347   : > { %2932 = vmatprep.mubr.msk.bf16.mxu1 %vm4096_vm0, %v4095_v1  ;;  %2917 = vmatpush3.bf16.msra.mxu1 %v3311_v57 }
 0x348   : > { %2918 = vmatprep.subr.bf16.mxu1 %v4095_v1 }
 0x34b   : > { %2919 = vmatpush3.bf16.msra.mxu1 %v3312_v58 }
 0x34c   : > { %2920 = vmatprep.subr.bf16.mxu1 %v4095_v1 }
 0x34f   : > { %2921 = vmatpush3.bf16.msra.mxu1 %v3313_v59 }
 0x350   : > { %2922 = vmatprep.subr.bf16.mxu1 %v4095_v1 }
 0x353   : > { %2923 = vmatpush3.bf16.msra.mxu1 %v3314_v60  ;;  %v3333_v60 = vld [vmem:[#allocation20 + $0x30] sm:$0xff]  }
 0x354   : > { %2924 = vmatprep.subr.bf16.mxu1 %v4095_v1 }
 0x357   : > { %2925 = vmatpush3.bf16.msra.mxu1 %v3315_v61  ;;  %v3334_v61 = vld [vmem:[#allocation20 + $0x38] sm:$0xff]  }
 0x358   : > { %2926 = vmatprep.subr.bf16.mxu1 %v4095_v1 }
 0x35b   : > { %2927 = vmatpush3.bf16.msra.mxu1 %v3316_v62  ;;  %v3335_v62 = vld [vmem:[#allocation23] ss:$8 sps:$4 sm:$0xff]  }
 0x35c   : > { %2928 = vmatprep.subr.bf16.mxu1 %v4095_v1 }
 0x35f   : > { %2929 = vmatpush3.bf16.msra.mxu1 %v3317_v17 }
 0x360   : > { %2930 = vmatprep.subr.bf16.mxu1 %v4095_v1 }
 0x363   : > { %2931 = vmatpush3.bf16.msra.mxu1 %v3318_v18 }
 0x364   : > { %2956 = vmatprep.subr.bf16.mxu1 %v4095_v1 }
 0x419   : > { %v1254_v4 = vpop.f32.mrb[0].mxu1 }
 0x41a   : > { %v1255_v6 = vadd.f32 %v2697_v3, %v1254_v4  ;;  %v2914_v7 = vpop.f32.mrb[1].mxu1  ;;  %v3338_v4 = vld [vmem:[#allocation23 + $0x10] ss:$8 sps:$4 sm:$0xff]  }
 0x41b   : > { %v1257_v8 = vpop.f32.mrb[2].mxu1  ;;  %v3344_v7 = vld [vmem:[#allocation23 + $0x30] ss:$8 sps:$4 sm:$0xff]  }
 0x41c   : > { %v1261_v10 = vadd.f32 %v1255_v6, %v1140_v5  ;;  %v1258_v11 = vadd.f32 %v2697_v3, %v1257_v8  ;;  %v2915_v12 = vpop.f32.mrb[3].mxu1  ;;  %v3340_v3 = vld [vmem:[#allocation23 + $0x14] ss:$8 sps:$4 sm:$0xff]   ;;  %v3343_v5 = vld [vmem:[#allocation23 + $0x24] ss:$8 sps:$4 sm:$0xff]  }
 0x41d   : > { %v3341_v6 = vld [vmem:[#allocation23 + $0x20] ss:$8 sps:$4 sm:$0xff]   ;;  %v3349_v8 = vld [vmem:[#allocation23 + $0x44] ss:$8 sps:$4 sm:$0xff]   ;;  %v2735_v12 = vld [vmem:[#allocation19] ss:$0 sm:$0xff] }
 0x41e   : > { %v1262_v13 = vadd.f32 %v1258_v11, %v1144_v9  ;;  %v1263_v14 = vmax.f32 %v1261_v10, 0.0  ;;  %v3347_v9 = vld [vmem:[#allocation23 + $0x40] ss:$8 sps:$4 sm:$0xff]   ;;  %v3352_v10 = vld [vmem:[#allocation23 + $0x54] ss:$8 sps:$4 sm:$0xff]  }
 0x41f   : > { %v3350_v11 = vld [vmem:[#allocation23 + $0x50] ss:$8 sps:$4 sm:$0xff]  }
 0x420   : > { %v1264_v15 = vmax.f32 %v1262_v13, 0.0 }
 0x422   : > { %v1265_v16 = vpack.c.bf16 %v1264_v15, %v1263_v14 }
 0x424   : > { %2826 = vst [vmem:[%s958_s22] sm:$0xff] %v1265_v16   ;;  %1416 = vmatmul.mubr.bf16.vlgmr.msra.gmra.mrb[4].mxu0 %v1265_v16  ;;  %s3857_s22 = sshll.u32 %s4097_s12, 4  ;;  %s3858_s22 = int_to_ptr.vmem [resolvable:$false] %s3857_s22 }
 0x425   : > { %2952 = vmatprep.mubr.msk.bf16.mxu0 %vm4096_vm0, %v4095_v1  ;;  %2937 = vmatpush3.bf16.msra.mxu0 %v3319_v19  ;;  %s3859_s13 = scalar_lea.vmem %s3858_s22, 256  ;;  %p3860_p6 = scmp.lt.s32.totalorder %s4870_s6, %s3858_s22 }
 0x426   : > { %2938 = vmatprep.subr.bf16.mxu0 %v4095_v1 }
 0x429   : > { %2939 = vmatpush3.bf16.msra.mxu0 %v3320_v20 }
 0x42a   : > { %2940 = vmatprep.subr.bf16.mxu0 %v4095_v1 }
 0x42d   : > { %2941 = vmatpush3.bf16.msra.mxu0 %v3321_v21 }
 0x42e   : > { %2942 = vmatprep.subr.bf16.mxu0 %v4095_v1 }
 0x431   : > { %2943 = vmatpush3.bf16.msra.mxu0 %v3322_v22  ;;  %v3355_v22 = vld [vmem:[#allocation23 + $0x64] ss:$8 sps:$4 sm:$0xff]  }
 0x432   : > { %2944 = vmatprep.subr.bf16.mxu0 %v4095_v1 }
 0x435   : > { %2945 = vmatpush3.bf16.msra.mxu0 %v3323_v23  ;;  %v3353_v23 = vld [vmem:[#allocation23 + $0x60] ss:$8 sps:$4 sm:$0xff]  }
 0x436   : > { %2946 = vmatprep.subr.bf16.mxu0 %v4095_v1 }
 0x439   : > { %2947 = vmatpush3.bf16.msra.mxu0 %v3324_v35 }
 0x43a   : > { %2948 = vmatprep.subr.bf16.mxu0 %v4095_v1 }
 0x43d   : > { %2949 = vmatpush3.bf16.msra.mxu0 %v3325_v36 }
 0x43e   : > { %2950 = vmatprep.subr.bf16.mxu0 %v4095_v1 }
 0x441   : > { %2951 = vmatpush3.bf16.msra.mxu0 %v3326_v37 }
 0x442   : > { %1904 = vmatprep.subr.bf16.mxu0 %v3337_v2  ;;  %v3372_v2 = vld [vmem:[%s5209_s29 + $0x28] sm:$0xff]  }
 0x4f7   : > { %v1417_v26 = vpop.f32.mrb[4].mxu0 }
 0x4f8   : > { %v1418_v27 = vadd.f32 %v1417_v26, %v1296_v25  ;;  %v1419_v28 = vpop.f32.mrb[5].mxu0  ;;  %v3359_v26 = vld [vmem:[#allocation26] sm:$0xff]  }
 0x4f9   : > { %v1421_v29 = vpop.f32.mrb[6].mxu0  ;;  %v1420_v48 = vadd.f32 %v1419_v28, %v1300_v45  ;;  %v3361_v28 = vld [vmem:[#allocation26 + $0x10] sm:$0xff]  }
 0x4fa   : > { %v1422_v30 = vadd.f32 %v1421_v29, %v1296_v25  ;;  %v1423_v31 = vpop.f32.mrb[7].mxu0  ;;  %v1426_v32 = vmax.f32 %v1418_v27, 0.0  ;;  %v3356_v25 = vld [vmem:[#allocation23 + $0x70] ss:$8 sps:$4 sm:$0xff]  }
 0x4fb   : > { %v1424_v52 = vadd.f32 %v1423_v31, %v1300_v45  ;;  %v3360_v27 = vld [vmem:[#allocation26 + $0x8] sm:$0xff]   ;;  %v3362_v29 = vld [vmem:[#allocation26 + $0x18] sm:$0xff]   ;;  %v3365_v45 = vld [vmem:[#allocation26 + $0x30] sm:$0xff]  }
 0x4fc   : > { %v1427_v33 = vmax.f32 %v1422_v30, 0.0  ;;  %v3363_v30 = vld [vmem:[#allocation26 + $0x20] sm:$0xff]   ;;  %v3364_v31 = vld [vmem:[#allocation26 + $0x28] sm:$0xff]  }
 0x4fe   : > { %v1428_v34 = vpack.c.bf16 %v1427_v33, %v1426_v32  ;;  %v2744_v32 = vld [vmem:[#allocation22] ss:$0 sm:$0xff] }
 0x500   : > { %2933 = vmatmul.mubr.bf16.vlgmr.msra.gmra.mrb[4].mxu1 %v1428_v34 }
 0x501   : > { %2972 = vmatprep.mubr.msk.bf16.mxu1 %vm4096_vm0, %v4095_v1  ;;  %2957 = vmatpush3.bf16.msra.mxu1 %v3327_v38 }
 0x502   : > { %2958 = vmatprep.subr.bf16.mxu1 %v4095_v1 }
 0x505   : > { %2959 = vmatpush3.bf16.msra.mxu1 %v3328_v39 }
 0x506   : > { %2960 = vmatprep.subr.bf16.mxu1 %v4095_v1 }
 0x509   : > { %2961 = vmatpush3.bf16.msra.mxu1 %v3329_v40 }
 0x50a   : > { %2962 = vmatprep.subr.bf16.mxu1 %v4095_v1 }
 0x50d   : > { %2963 = vmatpush3.bf16.msra.mxu1 %v3330_v42 }
 0x50e   : > { %2964 = vmatprep.subr.bf16.mxu1 %v4095_v1 }
 0x511   : > { %2965 = vmatpush3.bf16.msra.mxu1 %v3331_v43 }
 0x512   : > { %2966 = vmatprep.subr.bf16.mxu1 %v4095_v1 }
 0x515   : > { %2967 = vmatpush3.bf16.msra.mxu1 %v3332_v44 }
 0x516   : > { %2968 = vmatprep.subr.bf16.mxu1 %v4095_v1 }
 0x519   : > { %2969 = vmatpush3.bf16.msra.mxu1 %v3333_v60 }
 0x51a   : > { %2970 = vmatprep.subr.bf16.mxu1 %v4095_v1 }
 0x51d   : > { %2971 = vmatpush3.bf16.msra.mxu1 %v3334_v61 }
 0x51e   : > { %2976 = vmatprep.subr.bf16.mxu1 %v4095_v1 }
 0x5d3   : > { %v1534_v47 = vpop.f32.mrb[4].mxu1 }
 0x5d4   : > { %v1535_v49 = vadd.f32 %v2724_v46, %v1534_v47  ;;  %v2934_v50 = vpop.f32.mrb[5].mxu1  ;;  %v3367_v47 = vld [vmem:[%s5209_s29] sm:$0xff]  }
 0x5d5   : > { %v1537_v51 = vpop.f32.mrb[6].mxu1  ;;  %v3370_v50 = vld [vmem:[%s5209_s29 + $0x18] sm:$0xff]  }
 0x5d6   : > { %v4783_v53 = vadd.f32 %v1535_v49, %v1420_v48  ;;  %v1538_v54 = vadd.f32 %v2724_v46, %v1537_v51  ;;  %v2935_v55 = vpop.f32.mrb[7].mxu1  ;;  %v3366_v46 = vld [vmem:[#allocation26 + $0x38] sm:$0xff]   ;;  %v3368_v48 = vld [vmem:[%s5209_s29 + $0x8] sm:$0xff]   ;;  %v3371_v51 = vld [vmem:[%s5209_s29 + $0x20] sm:$0xff]  }
 0x5d7   : > { %v3369_v49 = vld [vmem:[%s5209_s29 + $0x10] sm:$0xff]  }
 0x5d8   : > { %v4785_v56 = vadd.f32 %v1538_v54, %v1424_v52  ;;  %v1543_v57 = vmax.f32 %v4783_v53, 0.0  ;;  %v1812_v52 = vld [vmem:[#allocation25] sm:$0x3] }
 0x5d9   : > { %v1817_v53 = vrot.slane %v1812_v52, %v4744_v41  ;;  %v3373_v41 = vld [vmem:[%s5209_s29 + $0x30] sm:$0xff]  }
 0x5da   : > { %v1544_v58 = vmax.f32 %v4785_v56, 0.0 }
 0x5dc   : > { %v1545_v59 = vpack.c.bf16 %v1544_v58, %v1543_v57 }
 0x5de   : > { %2831 = vst [vmem:[%s965_s5] sm:$0xff] %v1545_v59   ;;  %2953 = vmatmul.mubr.bf16.vlgmr.msra.gmra.mrb[8].mxu0 %v1545_v59 }
 0x5df   : > { %1936 = vmatprep.mubr.bf16.mxu0 %v4094_v0  ;;  %1905 = vmatpush1.bf16.msra.mxu0 %v3335_v62  ;;  %v3346_v0 = vld [vmem:[#allocation23 + $0x34] ss:$8 sps:$4 sm:$0xff]  }
 0x5e0   : > { %1906 = vmatprep.subr.bf16.mxu0 %v3340_v3  ;;  %v3374_v3 = vld [vmem:[%s5209_s29 + $0x38] sm:$0xff]  }
 0x5e3   : > { %1907 = vmatpush1.bf16.msra.mxu0 %v3338_v4  ;;  %v1821_v4 = vrot.slane %v1812_v52, %v4756_v63 }
 0x5e4   : > { %1908 = vmatprep.subr.bf16.mxu0 %v3343_v5  ;;  %v2771_v5 = vld [vmem:[#allocation28] ss:$0 sm:$0xff] }
 0x5e7   : > { %1909 = vmatpush1.bf16.msra.mxu0 %v3341_v6 }
 0x5e8   : > { %1910 = vmatprep.subr.bf16.mxu0 %v3346_v0 }
 0x5eb   : > { %1911 = vmatpush1.bf16.msra.mxu0 %v3344_v7 }
 0x5ec   : > { %1912 = vmatprep.subr.bf16.mxu0 %v3349_v8 }
 0x5ef   : > { %1913 = vmatpush1.bf16.msra.mxu0 %v3347_v9 }
 0x5f0   : > { %1914 = vmatprep.subr.bf16.mxu0 %v3352_v10 }
 0x5f3   : > { %1915 = vmatpush1.bf16.msra.mxu0 %v3350_v11 }
 0x5f4   : > { %1916 = vmatprep.subr.bf16.mxu0 %v3355_v22 }
 0x5f7   : > { %1917 = vmatpush1.bf16.msra.mxu0 %v3353_v23 }
 0x5f8   : > { %1918 = vmatprep.subr.bf16.mxu0 %v3358_v24 }
 0x5fb   : > { %1919 = vmatpush1.bf16.msra.mxu0 %v3356_v25 }
 0x5fc   : > { %2996 = vmatprep.subr.bf16.mxu0 %v4095_v1 }
 0x6b1   : > { %v1660_v13 = vpop.f32.mrb[8].mxu0 }
 0x6b2   : > { %v1661_v14 = vadd.f32 %v2735_v12, %v1660_v13  ;;  %v2954_v15 = vpop.f32.mrb[9].mxu0 }
 0x6b3   : > { %v1663_v16 = vpop.f32.mrb[10].mxu0 }
 0x6b4   : > { %v1664_v17 = vadd.f32 %v2735_v12, %v1663_v16  ;;  %v2955_v18 = vpop.f32.mrb[11].mxu0  ;;  %v1667_v19 = vmax.f32 %v1661_v14, 0.0 }
 0x6b6   : > { %v1668_v20 = vmax.f32 %v1664_v17, 0.0 }
 0x6b8   : > { %v1669_v21 = vpack.c.bf16 %v1668_v20, %v1667_v19 }
 0x6ba   : > { %2973 = vmatmul.mubr.bf16.vlgmr.msra.gmra.mrb[8].mxu1 %v1669_v21 }
 0x6bb   : > { %2992 = vmatprep.mubr.msk.bf16.mxu1 %vm4096_vm0, %v4095_v1  ;;  %2977 = vmatpush3.bf16.msra.mxu1 %v3359_v26 }
 0x6bc   : > { %2978 = vmatprep.subr.bf16.mxu1 %v4095_v1 }
 0x6bf   : > { %2979 = vmatpush3.bf16.msra.mxu1 %v3360_v27 }
 0x6c0   : > { %2980 = vmatprep.subr.bf16.mxu1 %v4095_v1 }
 0x6c3   : > { %2981 = vmatpush3.bf16.msra.mxu1 %v3361_v28 }
 0x6c4   : > { %2982 = vmatprep.subr.bf16.mxu1 %v4095_v1 }
 0x6c7   : > { %2983 = vmatpush3.bf16.msra.mxu1 %v3362_v29 }
 0x6c8   : > { %2984 = vmatprep.subr.bf16.mxu1 %v4095_v1 }
 0x6cb   : > { %2985 = vmatpush3.bf16.msra.mxu1 %v3363_v30 }
 0x6cc   : > { %2986 = vmatprep.subr.bf16.mxu1 %v4095_v1 }
 0x6cf   : > { %2987 = vmatpush3.bf16.msra.mxu1 %v3364_v31 }
 0x6d0   : > { %2988 = vmatprep.subr.bf16.mxu1 %v4095_v1 }
 0x6d3   : > { %2989 = vmatpush3.bf16.msra.mxu1 %v3365_v45 }
 0x6d4   : > { %2990 = vmatprep.subr.bf16.mxu1 %v4095_v1 }
 0x6d7   : > { %2991 = vmatpush3.bf16.msra.mxu1 %v3366_v46 }
 0x78d   : > { %v1775_v33 = vpop.f32.mrb[8].mxu1 }
 0x78e   : > { %v1776_v34 = vadd.f32 %v2744_v32, %v1775_v33  ;;  %v2974_v35 = vpop.f32.mrb[9].mxu1 }
 0x78f   : > { %v1778_v36 = vpop.f32.mrb[10].mxu1 }
 0x790   : > { %v1782_v37 = vadd.f32 %v1776_v34, %v1543_v57  ;;  %v1779_v38 = vadd.f32 %v2744_v32, %v1778_v36  ;;  %v2975_v39 = vpop.f32.mrb[11].mxu1 }
 0x792   : > { %v1783_v40 = vadd.f32 %v1779_v38, %v1544_v58  ;;  %v1784_v42 = vmax.f32 %v1782_v37, 0.0 }
 0x794   : > { %v1785_v43 = vmax.f32 %v1783_v40, 0.0 }
 0x796   : > { %v1786_v44 = vpack.c.bf16 %v1785_v43, %v1784_v42 }
 0x798   : > { %2836 = vst [vmem:[%s5126_s7] sm:$0xff] %v1786_v44   ;;  %1937 = vmatmul.mubr.bf16.vlgmr.msra.gmra.mrb[12].mxu0 %v1786_v44  ;;  %s4857_s7 = sshll.u32 %s965_s5, 4  ;;  %s3853_s5 = scalar_lea.vmem %s4870_s6, 128  ;;  %s4908_s7 = int_to_ptr.vmem [resolvable:$true] %s4857_s7 }
 0x799   : > { %3012 = vmatprep.mubr.msk.bf16.mxu0 %vm4096_vm0, %v4095_v1  ;;  %2997 = vmatpush3.bf16.msra.mxu0 %v3367_v47  ;;  %p3854_p4 = scmp.ne.s32.totalorder %s4870_s6, %s3853_s5  ;;  %p3861_p5 = scmp.lt.s32.totalorder %s3859_s13, %s3853_s5 }
 0x79a   : > { %2998 = vmatprep.subr.bf16.mxu0 %v4095_v1 }
 0x79b   : > { %p3855_p0 = pnand %p3854_p4, %p5211_p3  ;;  %p3862_p10 = por %p3861_p5, %p3860_p6 }
 0x79d   : > { %2999 = vmatpush3.bf16.msra.mxu0 %v3368_v48  ;;  %p3856_p2 = pneg %p3855_p0 }
 0x79e   : > { %3000 = vmatprep.subr.bf16.mxu0 %v4095_v1 }
 0x79f   : > { %p3863_p1 = pnand %p3862_p10, %p3856_p2 }
 0x7a1   : > { %3001 = vmatpush3.bf16.msra.mxu0 %v3369_v49 }
 0x7a2   : > { %3002 = vmatprep.subr.bf16.mxu0 %v4095_v1 }
 0x7a5   : > { %3003 = vmatpush3.bf16.msra.mxu0 %v3370_v50 }
 0x7a6   : > { %3004 = vmatprep.subr.bf16.mxu0 %v4095_v1 }
 0x7a9   : > { %3005 = vmatpush3.bf16.msra.mxu0 %v3371_v51 }
 0x7aa   : > { %3006 = vmatprep.subr.bf16.mxu0 %v4095_v1 }
 0x7ad   : > { %3007 = vmatpush3.bf16.msra.mxu0 %v3372_v2 }
 0x7ae   : > { %3008 = vmatprep.subr.bf16.mxu0 %v4095_v1 }
 0x7b1   : > { %3009 = vmatpush3.bf16.msra.mxu0 %v3373_v41 }
 0x7b2   : > { %3010 = vmatprep.subr.bf16.mxu0 %v4095_v1 }
 0x7b5   : > { %3011 = vmatpush3.bf16.msra.mxu0 %v3374_v3 }
 0x86b   : > { %v1938_v54 = vpop.f32.mrb[12].mxu0 }
 0x86c   : > { %v1939_v55 = vadd.f32 %v1938_v54, %v1817_v53  ;;  %v1940_v56 = vpop.f32.mrb[13].mxu0 }
 0x86d   : > { %v1942_v57 = vpop.f32.mrb[14].mxu0  ;;  %v1941_v0 = vadd.f32 %v1940_v56, %v1821_v4 }
 0x86e   : > { %v1943_v58 = vadd.f32 %v1942_v57, %v1817_v53  ;;  %v1944_v59 = vpop.f32.mrb[15].mxu0  ;;  %v1947_v60 = vmax.f32 %v1939_v55, 0.0 }
 0x86f   : > { %v1945_v1 = vadd.f32 %v1944_v59, %v1821_v4 }
 0x870   : > { %v1948_v61 = vmax.f32 %v1943_v58, 0.0 }
 0x872   : > { %v1949_v62 = vpack.c.bf16 %v1948_v61, %v1947_v60 }
 0x874   : > { %2993 = vmatmul.mubr.bf16.vlgmr.msra.gmra.mrb[12].mxu1 %v1949_v62 }
 0x947   : > { %v2055_v6 = vpop.f32.mrb[12].mxu1 }
 0x948   : > { %v2056_v7 = vadd.f32 %v2771_v5, %v2055_v6  ;;  %v2994_v8 = vpop.f32.mrb[13].mxu1 }
 0x949   : > { %v2058_v9 = vpop.f32.mrb[14].mxu1 }
 0x94a   : > { %v2062_v10 = vadd.f32 %v2056_v7, %v1941_v0  ;;  %v2059_v11 = vadd.f32 %v2771_v5, %v2058_v9  ;;  %v2995_v12 = vpop.f32.mrb[15].mxu1 }
 0x94c   : > { %v2063_v13 = vadd.f32 %v2059_v11, %v1945_v1  ;;  %v2064_v14 = vmax.f32 %v2062_v10, 0.0 }
 0x94e   : > { %v2065_v63 = vmax.f32 %v2063_v13, 0.0 }
 0x950   : > { %v2066_v15 = vpack.c.bf16 %v2065_v63, %v2064_v14 }
 0x952   : > { %2841 = vst [vmem:[%s5127_s4] sm:$0xff] %v2066_v15   ;;  %3013 = vmatmul.mubr.bf16.vlgmr.msra.gmra.mrb[16].mxu0 %v2066_v15  ;;  %s4874_s4 = scalar_lea.sflag [#allocation31], %s5128_s21 }
 0x953   : > { %3866 = shalt.err (!%p3863_p1)
}
 0x954   : > { %s3867_s1 = scalar_lea.hbm %s4868_s11, 128  ;;  %s3871_s12 = scalar_lea.hbm %s5210_s17, 256 }
 0x955   : > { %p3868_p11 = scmp.ne.s32.totalorder %s4868_s11, %s3867_s1  ;;  %p3872_p8 = scmp.lt.u32.totalorder %s4868_s11, %s5210_s17 }
 0x956   : > { %p3873_p7 = scmp.lt.u32.totalorder %s3871_s12, %s3867_s1  ;;  %p3875_p4 = scmp.lt.u32.totalorder %s3867_s1, %s4868_s11 }
 0x957   : > { %p3869_p12 = pnand %p3868_p11, %p5211_p3 }
 0x958   : > { %p3874_p9 = por %p3873_p7, %p3872_p8 }
 0x959   : > { %p3870_p13 = pneg %p3869_p12 }
 0x95a   : > { %p3876_p0 = por %p3875_p4, %p3874_p9 }
 0x95c   : > { %p3877_p2 = pnand %p3876_p0, %p3870_p13 }
 0x95e   : > { %3880 = shalt.err (!%p3877_p2)
}
 0x95f   : > { %s4098_s13 = smov 64   ;;  %s4099_s21 = smov 4  }
 0x960   : > { %3083 = dma.vmem_to_hbm [thread:$0]  (%p5211_p3), %s4870_s6, 128, %s4868_s11, %s4874_s4, %s4098_s13, %s4098_s13, %s4099_s21  }
 0x961   : > { %s5212_s1 = sld [smem:[#allocation73_spill]]  ;;  %s5213_s12 = scalar_lea.vmem [#allocation33], %s4689_s28 }
 0x962   : > { %s2272_s22 = sshll.u32 %s5213_s12, 4  ;;  %s5214_s15 = scalar_lea.vmem [#allocation35], %s4689_s28  ;;  %s4916_s22 = int_to_ptr.vmem [resolvable:$true] %s2272_s22 }
 0x963   : > { %s4914_s16 = sshll.u32 %s5214_s15, 4  ;;  %s5215_s17 = sand.u32 1, %s5192_s10   ;;  %s4948_s16 = int_to_ptr.vmem [resolvable:$true] %s4914_s16 }
 0x964   : > { %s4920_s19 = scalar_lea.sflag [#allocation34], %s5215_s17  ;;  %s3881_s11 = scalar_lea.vmem %s4916_s22, 128 }
 0x965   : > { %p3882_p6 = scmp.ne.s32.totalorder %s4916_s22, %s3881_s11  ;;  %s4100_s6 = smov [#allocation33]  }
 0x966   : > { %s3885_s14 = sshll.u32 %s4100_s6, 4  ;;  %s3886_s14 = int_to_ptr.vmem [resolvable:$false] %s3885_s14 }
 0x967   : > { %s4905_s8 = scalar_lea.hbm %s5212_s1, %s4860_s9  ;;  %p3883_p5 = pnand %p3882_p6, %p5211_p3 }
 0x968   : > { %s3887_s5 = scalar_lea.vmem %s3886_s14, 256  ;;  %p3888_p1 = scmp.lt.s32.totalorder %s4916_s22, %s3886_s14 }
 0x969   : > { %p3884_p10 = pneg %p3883_p5  ;;  %p3889_p11 = scmp.lt.s32.totalorder %s3887_s5, %s3881_s11 }
 0x96b   : > { %p3890_p12 = por %p3889_p11, %p3888_p1 }
 0x96d   : > { %p3891_p13 = pnand %p3890_p12, %p3884_p10 }
 0x96f   : > { %3894 = shalt.err (!%p3891_p13)
}
 0x970   : > { %s3895_s15 = scalar_lea.hbm %s4905_s8, 128  ;;  %s3899_s12 = scalar_lea.hbm %s5212_s1, 256 }
 0x971   : > { %p3896_p8 = scmp.ne.s32.totalorder %s4905_s8, %s3895_s15  ;;  %p3900_p4 = scmp.lt.u32.totalorder %s4905_s8, %s5212_s1 }
 0x972   : > { %p3901_p0 = scmp.lt.u32.totalorder %s3899_s12, %s3895_s15  ;;  %p3903_p6 = scmp.lt.u32.totalorder %s3895_s15, %s4905_s8 }
 0x973   : > { %p3897_p7 = pnand %p3896_p8, %p5211_p3 }
 0x974   : > { %p3902_p2 = por %p3901_p0, %p3900_p4 }
 0x975   : > { %p3898_p9 = pneg %p3897_p7 }
 0x976   : > { %p3904_p5 = por %p3903_p6, %p3902_p2 }
 0x978   : > { %p3905_p10 = pnand %p3904_p5, %p3898_p9 }
 0x97a   : > { %3908 = shalt.err (!%p3905_p10)
}
 0x97b   : > { %3085 = dma.vmem_to_hbm [thread:$0]  (%p5211_p3), %s4916_s22, 128, %s4905_s8, %s4920_s19, %s4098_s13, %s4098_s13, %s4099_s21  }
 0x97c   : > { %s5216_s15 = sld [smem:[#allocation72_spill]]  ;;  %s3909_s17 = scalar_lea.vmem %s4908_s7, 128 }
 0x97d   : > { %p3910_p1 = scmp.ne.s32.totalorder %s4908_s7, %s3909_s17  ;;  %s4101_s12 = smov [#allocation32]  }
 0x97e   : > { %s3913_s6 = sshll.u32 %s4101_s12, 4  ;;  %s3914_s6 = int_to_ptr.vmem [resolvable:$false] %s3913_s6 }
 0x97f   : > { %p3911_p11 = pnand %p3910_p1, %p5211_p3  ;;  %s3915_s14 = scalar_lea.vmem %s3914_s6, 256 }
 0x980   : > { %p3916_p13 = scmp.lt.s32.totalorder %s4908_s7, %s3914_s6  ;;  %p3917_p8 = scmp.lt.s32.totalorder %s3915_s14, %s3909_s17 }
 0x981   : > { %p3912_p12 = pneg %p3911_p11 }
 0x982   : > { %s4954_s28 = scalar_lea.hbm %s5216_s15, %s4860_s9  ;;  %p3918_p7 = por %p3917_p8, %p3916_p13 }
 0x984   : > { %p3919_p9 = pnand %p3918_p7, %p3912_p12 }
 0x986   : > { %3922 = shalt.err (!%p3919_p9)
}
 0x987   : > { %s3923_s8 = scalar_lea.hbm %s4954_s28, 128  ;;  %s3927_s5 = scalar_lea.hbm %s5216_s15, 256 }
 0x988   : > { %p3924_p4 = scmp.ne.s32.totalorder %s4954_s28, %s3923_s8  ;;  %p3928_p6 = scmp.lt.u32.totalorder %s4954_s28, %s5216_s15 }
 0x989   : > { %p3929_p5 = scmp.lt.u32.totalorder %s3927_s5, %s3923_s8  ;;  %p3931_p1 = scmp.lt.u32.totalorder %s3923_s8, %s4954_s28 }
 0x98a   : > { %p3925_p0 = pnand %p3924_p4, %p5211_p3 }
 0x98b   : > { %p3930_p10 = por %p3929_p5, %p3928_p6 }
 0x98c   : > { %p3926_p2 = pneg %p3925_p0 }
 0x98d   : > { %p3932_p11 = por %p3931_p1, %p3930_p10 }
 0x98f   : > { %p3933_p12 = pnand %p3932_p11, %p3926_p2 }
 0x991   : > { %3936 = shalt.err (!%p3933_p12)
}
 0x992   : > { %3084 = dma.vmem_to_hbm [thread:$0]  (%p5211_p3), %s4908_s7, 128, %s4954_s28, %s4874_s4, %s4098_s13, %s4098_s13, %s4099_s21  }
 0x993   : > { %s5217_s8 = sld [smem:[#allocation74_spill]]  ;;  %s3937_s11 = scalar_lea.vmem %s4948_s16, 128 }
 0x994   : > { %p3938_p13 = scmp.ne.s32.totalorder %s4948_s16, %s3937_s11  ;;  %s4102_s5 = smov [#allocation35]  }
 0x995   : > { %s3941_s12 = sshll.u32 %s4102_s5, 4  ;;  %s3942_s12 = int_to_ptr.vmem [resolvable:$false] %s3941_s12 }
 0x996   : > { %p3939_p8 = pnand %p3938_p13, %p5211_p3  ;;  %s3943_s6 = scalar_lea.vmem %s3942_s12, 256 }
 0x997   : > { %p3944_p9 = scmp.lt.s32.totalorder %s4948_s16, %s3942_s12  ;;  %p3945_p4 = scmp.lt.s32.totalorder %s3943_s6, %s3937_s11 }
 0x998   : > { %p3940_p7 = pneg %p3939_p8 }
 0x999   : > { %s4985_s22 = scalar_lea.hbm %s5217_s8, %s4860_s9  ;;  %p3946_p0 = por %p3945_p4, %p3944_p9 }
 0x99b   : > { %p3947_p2 = pnand %p3946_p0, %p3940_p7 }
 0x99d   : > { %3950 = shalt.err (!%p3947_p2)
}
 0x99e   : > { %s3951_s4 = scalar_lea.hbm %s4985_s22, 128  ;;  %s3955_s28 = scalar_lea.hbm %s5217_s8, 256 }
 0x99f   : > { %p3952_p6 = scmp.ne.s32.totalorder %s4985_s22, %s3951_s4  ;;  %p3956_p1 = scmp.lt.u32.totalorder %s4985_s22, %s5217_s8 }
 0x9a0   : > { %p3957_p11 = scmp.lt.u32.totalorder %s3955_s28, %s3951_s4  ;;  %p3959_p13 = scmp.lt.u32.totalorder %s3951_s4, %s4985_s22 }
 0x9a1   : > { %p3953_p5 = pnand %p3952_p6, %p5211_p3 }
 0x9a2   : > { %p3958_p12 = por %p3957_p11, %p3956_p1 }
 0x9a3   : > { %p3954_p10 = pneg %p3953_p5 }
 0x9a4   : > { %p3960_p8 = por %p3959_p13, %p3958_p12 }
 0x9a6   : > { %p3961_p7 = pnand %p3960_p8, %p3954_p10 }
 0x9a8   : > { %3964 = shalt.err (!%p3961_p7)
}
 0x9a9   : > { %3086 = dma.vmem_to_hbm [thread:$0]  (%p5211_p3), %s4948_s16, 128, %s4985_s22, %s4920_s19, %s4098_s13, %s4098_s13, %s4099_s21  }
 0x9aa   : > { %s2675_s11 = sshll.u32 %s4686_s18, 4  ;;  %s5218_s6 = sld [smem:[#allocation69_spill]] }
 0x9ab   : > { %s951_s4 = scalar_lea.vmem [#allocation29], %s2675_s11  ;;  %s2817_s9 = sshll.u32 %s5192_s10, 8 }
 0x9ac   : > { %s2224_s7 = sshll.u32 %s951_s4, 4  ;;  %s5219_s13 = sld [smem:[#allocation70_spill]]  ;;  %s5017_s7 = int_to_ptr.vmem [resolvable:$true] %s2224_s7 }
 0x9ad   : > { %s2191_s22 = scalar_lea.sflag [#allocation4], %s4686_s18  ;;  %s3965_s10 = scalar_lea.vmem %s5017_s7, 256 }
 0x9ae   : > { %p3966_p9 = scmp.ne.s32.totalorder %s5017_s7, %s3965_s10  ;;  %s4103_s28 = smov [#allocation29]  }
 0x9af   : > { %s3969_s17 = sshll.u32 %s4103_s28, 4  ;;  %s3970_s17 = int_to_ptr.vmem [resolvable:$false] %s3969_s17 }
 0x9b0   : > { %v2782_v16 = vld [vmem:[%s5218_s6] ss:$0 sm:$0xff]  ;;  %p3967_p4 = pnand %p3966_p9, %p5211_p3  ;;  %s3971_s14 = scalar_lea.vmem %s3970_s17, 512 }
 0x9b1   : > { %p3972_p2 = scmp.lt.s32.totalorder %s5017_s7, %s3970_s17  ;;  %p3973_p6 = scmp.lt.s32.totalorder %s3971_s14, %s3965_s10 }
 0x9b2   : > { %s5022_s21 = scalar_lea.hbm %s5219_s13, %s2817_s9  ;;  %p3968_p0 = pneg %p3967_p4 }
 0x9b3   : > { %p3974_p5 = por %p3973_p6, %p3972_p2 }
 0x9b5   : > { %p3975_p10 = pnand %p3974_p5, %p3968_p0 }
 0xa25   : > { %v2181_v17 = vpop.f32.mrb[16].mxu0 }
 0xa26   : > { %v2182_v18 = vadd.f32 %v2782_v16, %v2181_v17  ;;  %v3014_v19 = vpop.f32.mrb[17].mxu0 }
 0xa27   : > { %v2184_v20 = vpop.f32.mrb[18].mxu0 }
 0xa28   : > { %2188 = vst [vmem:[%s951_s4] sm:$0xff] %v2182_v18  ;;  %v2185_v21 = vadd.f32 %v2782_v16, %v2184_v20  ;;  %v3015_v22 = vpop.f32.mrb[19].mxu0 }
 0xa2a   : > { %2189 = vst [vmem:[%s951_s4 + $0x8] sm:$0xff] %v2185_v21 }
 0xa2b   : > { %3978 = shalt.err (!%p3975_p10)
}
 0xa2c   : > { %s3979_s11 = scalar_lea.hbm %s5022_s21, 256  ;;  %s3983_s6 = scalar_lea.hbm %s5219_s13, 512 }
 0xa2d   : > { %p3980_p1 = scmp.ne.s32.totalorder %s5022_s21, %s3979_s11  ;;  %p3984_p13 = scmp.lt.u32.totalorder %s5022_s21, %s5219_s13 }
 0xa2e   : > { %p3985_p8 = scmp.lt.u32.totalorder %s3983_s6, %s3979_s11  ;;  %p3987_p9 = scmp.lt.u32.totalorder %s3979_s11, %s5022_s21 }
 0xa2f   : > { %p3981_p11 = pnand %p3980_p1, %p5211_p3 }
 0xa30   : > { %p3986_p7 = por %p3985_p8, %p3984_p13 }
 0xa31   : > { %p3982_p12 = pneg %p3981_p11 }
 0xa32   : > { %p3988_p4 = por %p3987_p9, %p3986_p7 }
 0xa34   : > { %p3989_p0 = pnand %p3988_p4, %p3982_p12 }
 0xa36   : > { %3992 = shalt.err (!%p3989_p0)
}
 0xa37   : > { %s4104_s16 = smov 128   ;;  %s4105_s19 = smov 8  }
 0xa38   : > { %3082 = dma.vmem_to_hbm [thread:$0]  (%p5211_p3), %s5017_s7, 256, %s5022_s21, %s2191_s22, %s4104_s16, %s4104_s16, %s4105_s19  }
 0xa39 PF: > { %s5220_s10 = sld [smem:[#allocation48_spill]]  ;;  %p5221_p2 = scmp.ne.s32.totalorder %s5187_s3, 0 }
 0xa3a   : > { %p5222_p6 = scmp.ge.s32.totalorder %s4071_s25, 2 }
 0xa3c   : > { %p3146_p5 = pnand %p5222_p6, %p5221_p2 }
 0xa3f   : > { %s2303_s28 = sand.u32 1, %s5220_s10  }
 0xa40   : > { %s2304_s17 = scalar_lea.sflag [#allocation4], %s2303_s28 }
 0xa41   : > { %4046 = dma.done.wait (!%p3146_p5), %s2304_s17, 256  }
 0xa42   : > { %4048 = vsyncadd (!%p3146_p5), %s2304_s17, 4294967040  ;;  %s5223_s14 = sadd.s32 4294967294, %s4071_s25  }
 0xa43   : > { %s2312_s11 = sand.u32 1, %s5223_s14  }
 0xa44   : > { %s2313_s5 = scalar_lea.sflag [#allocation31], %s2312_s11 }
 0xa45   : > { %4050 = dma.done.wait (!%p3146_p5), %s2313_s5, 256  }
 0xa46   : > { %4052 = vsyncadd (!%p3146_p5), %s2313_s5, 4294967040  ;;  %s2331_s27 = scalar_lea.sflag [#allocation34], %s2312_s11 }
 0xa47   : > { %4054 = dma.done.wait (!%p3146_p5), %s2331_s27, 256  }
 0xa48   : > { %4056 = vsyncadd (!%p3146_p5), %s2331_s27, 4294967040  ;;  %p51_p3 = scmp.ge.s32.totalorder %s4602_s0, 4   ;;  %s5224_s4 = smov %s4063_s30 }
 0xa49   : > { %s5225_s30 = smov %s4067_s24  ;;  %s5226_s24 = smov %s4613_s2 }
 0xa4a   : > { %s5227_s25 = smov %s4602_s0  ;;  %53 = sbr.rel (!%p51_p3) target bundleno = 42 (0x2a), region = 269 }
 0xa51   :  { %2345 = vsyncpa [#allocation3], 1 }
 0xa52   :  { %2347 = vsyncpa [#allocation3 + $0x1], 1 }
 0xa53   :  { %2348 = vsyncpa [#allocation6], 1 }
 0xa54   :  { %2349 = vsyncpa [#allocation9], 1 }
 0xa55   :  { %2350 = vsyncpa [#allocation12], 1 }
 0xa56   :  { %2351 = vsyncpa [#allocation15], 1 }
 0xa57   :  { %2352 = vsyncpa [#allocation18], 1 }
 0xa58   :  { %2353 = vsyncpa [#allocation21], 1 }
 0xa59   :  { %2354 = vsyncpa [#allocation24], 1 }
 0xa5a   :  { %2355 = vsyncpa [#allocation27], 1 }
 0xa5b   :  { %2356 = vsyncpa [#allocation4], 1 }
 0xa5c   :  { %2358 = vsyncpa [#allocation4 + $0x1], 1 }
 0xa5d   :  { %2359 = vsyncpa [#allocation31], 1 }
 0xa5e   :  { %2361 = vsyncpa [#allocation31 + $0x1], 1 }
 0xa5f   :  { %2362 = vsyncpa [#allocation34], 1 }
 0xa60   :  { %2364 = vsyncpa [#allocation34 + $0x1], 1 }

</bundles_post_ra>
